<compile_context>
chip_gen: v7x
topology: tpu7x:2x2x1
jax: 0.10.0
libtpu: 0.0.40
codegen_flags: <defaults>
</compile_context>

<pallas_src>
import functools

import jax
import jax.numpy as jnp
from jax.experimental import pallas as pl
from jax.experimental.pallas import tpu as pltpu

HIDDEN = 768
EPS = 1e-5
LANE = 128


def _round_up(x, m):
    return (x + m - 1) // m * m


def _choose_tiling(feature_size, tn_target):
    """Lane-only padding; tiles of ~equal width (multiple of 128)."""
    f128 = _round_up(feature_size, LANE)
    n_tiles = max(1, -(-f128 // tn_target))          # cdiv on python ints
    tn_eff = _round_up(-(-f128 // n_tiles), LANE)    # per-tile width
    f_pad = n_tiles * tn_eff                         # waste < n_tiles*128 cols
    return tn_eff, f_pad, n_tiles


def bertfc_kernel(x_ref, gamma_ref, beta_ref, w_ref, b_ref, o_ref, y_ref):
    # x_ref:     [B, H]    f32   (full batch, resident across all grid steps)
    # gamma_ref: [1, H]    f32   BN weight
    # beta_ref:  [1, H]    f32   BN bias
    # w_ref:     [H, TN]   bf16  Linear weight tile (pre-transposed)
    # b_ref:     [1, TN]   f32   Linear bias tile
    # o_ref:     [B, TN]   f32
    # y_ref:     [B, H]    bf16  VMEM scratch: BN(x), computed once at j == 0

    @pl.when(pl.program_id(0) == 0)
    def _():
        # --- BatchNorm1d folded into scale/shift (training-mode batch stats).
        # Hoisted out of the steady-state tile loop: one XLU reduction, one
        # EUP rsqrt and one bf16 repack per call instead of per tile.
        x = x_ref[...]
        mean = jnp.mean(x, axis=0, keepdims=True)                   # [1, H]
        centered = x - mean
        var = jnp.mean(centered * centered, axis=0, keepdims=True)  # [1, H]
        inv_std = jax.lax.rsqrt(var + EPS)
        scale = gamma_ref[...] * inv_std                            # [1, H]
        shift = beta_ref[...] - mean * scale                        # [1, H]
        y_ref[...] = (x * scale + shift).astype(jnp.bfloat16)       # [B, H]

    # --- Linear tile: y @ W_tile + b_tile (bf16 MXU inputs, f32 accumulate).
    out = jnp.dot(y_ref[...], w_ref[...], preferred_element_type=jnp.float32)
    o_ref[...] = out + b_ref[...]


@functools.partial(jax.jit, static_argnames=("tn",))
def bertfc_forward(x, gamma, beta, w, b, *, tn=2048):
    """x: [B, 768]; gamma/beta: [768]; w: [F, 768] (PyTorch layout); b: [F]."""
    B, H = x.shape
    assert H == HIDDEN
    F = w.shape[0]

    tn_eff, f_pad, n_tiles = _choose_tiling(F, tn)

    # Weight -> [H, F_pad] bf16 (zero padded); bias -> [1, F_pad] f32 (zero
    # padded so padded output columns are exactly b=0 and slice off cleanly).
    w_t = jnp.zeros((HIDDEN, f_pad), jnp.bfloat16).at[:, :F].set(
        w.T.astype(jnp.bfloat16))
    b_pad = jnp.zeros((1, f_pad), jnp.float32).at[0, :F].set(
        b.astype(jnp.float32))

    gamma2 = gamma.reshape(1, HIDDEN).astype(jnp.float32)
    beta2 = beta.reshape(1, HIDDEN).astype(jnp.float32)
    x32 = x.astype(jnp.float32)

    cost = pl.CostEstimate(
        flops=2 * B * HIDDEN * f_pad,
        transcendentals=HIDDEN,  # rsqrt over the hidden dim (once per call)
        bytes_accessed=HIDDEN * f_pad * 2 + B * HIDDEN * 4 + B * f_pad * 4,
    )

    out = pl.pallas_call(
        bertfc_kernel,
        out_shape=jax.ShapeDtypeStruct((B, f_pad), jnp.float32),
        grid_spec=pltpu.PrefetchScalarGridSpec(
            num_scalar_prefetch=0,
            grid=(n_tiles,),
            in_specs=[
                pl.BlockSpec((B, HIDDEN), lambda j: (0, 0)),        # x (resident)
                pl.BlockSpec((1, HIDDEN), lambda j: (0, 0)),        # gamma
                pl.BlockSpec((1, HIDDEN), lambda j: (0, 0)),        # beta
                pl.BlockSpec((HIDDEN, tn_eff), lambda j: (0, j)),   # weight tile
                pl.BlockSpec((1, tn_eff), lambda j: (0, j)),        # bias tile
            ],
            out_specs=pl.BlockSpec((B, tn_eff), lambda j: (0, j)),
            scratch_shapes=[pltpu.VMEM((B, HIDDEN), jnp.bfloat16)],  # BN(x)
        ),
        compiler_params=pltpu.CompilerParams(
            # Single-TC chips (v5e/v6e): "arbitrary" makes the j==0 BN init
            # pattern safe and costs nothing.
            dimension_semantics=("arbitrary",),
        ),
        cost_estimate=cost,
    )(x32, gamma2, beta2, w_t, b_pad)

    return out[:, :F]


if __name__ == "__main__":
    B = 8
    FEATURE_SIZE = 1000  # not a multiple of 128: exercises lane padding

    key = jax.random.PRNGKey(0)
    k_x, k_g, k_b, k_w, k_lb = jax.random.split(key, 5)

    x = jax.random.normal(k_x, (B, HIDDEN), dtype=jnp.float32)
    gamma = 1.0 + 0.1 * jax.random.normal(k_g, (HIDDEN,), dtype=jnp.float32)
    beta = 0.1 * jax.random.normal(k_b, (HIDDEN,), dtype=jnp.float32)
    w = 0.02 * jax.random.normal(k_w, (FEATURE_SIZE, HIDDEN), dtype=jnp.float32)
    lb = 0.1 * jax.random.normal(k_lb, (FEATURE_SIZE,), dtype=jnp.float32)

    out = bertfc_forward(x, gamma, beta, w, lb)
    out = jax.block_until_ready(out)

    # Reference in plain JAX (same semantics; bf16-faithful matmul operands).
    mean = jnp.mean(x, axis=0, keepdims=True)
    var = jnp.mean((x - mean) ** 2, axis=0, keepdims=True)
    scale = gamma * jax.lax.rsqrt(var + EPS)
    shift = beta - mean * scale
    y_bf = (x * scale + shift).astype(jnp.bfloat16).astype(jnp.float32)
    w_bf = w.astype(jnp.bfloat16).astype(jnp.float32)
    ref = y_bf @ w_bf.T + lb

    assert out.shape == (B, FEATURE_SIZE)
    err = float(jnp.max(jnp.abs(out - ref)))
    assert jnp.allclose(out, ref, atol=1e-2, rtol=1e-2), f"max abs err = {err}"

    print("KERNEL_OK")
</pallas_src>

<mosaic_0001>
module attributes {stable_mosaic.version = 11 : i64} {
  func.func @bertfc_kernel(%arg0: i32, %arg1: memref<8x768xf32, #tpu.memory_space<vmem>>, %arg2: memref<1x768xf32, #tpu.memory_space<vmem>>, %arg3: memref<1x768xf32, #tpu.memory_space<vmem>>, %arg4: memref<768x1024xbf16, #tpu.memory_space<vmem>>, %arg5: memref<1x1024xf32, #tpu.memory_space<vmem>>, %arg6: memref<8x1024xf32, #tpu.memory_space<vmem>>, %arg7: memref<8x768xbf16, #tpu.memory_space<vmem>>) attributes {dimension_semantics = [#tpu.dimension_semantics<arbitrary>], iteration_bounds = array<i64: 1>, scalar_prefetch = 0 : i64, scratch_operands = 1 : i64, tpu.core_type = #tpu.core_type<tc>, window_params = [{pipeline_mode = #tpu.pipeline_mode<synchronous>, transform_indices = @transform_0, window_bounds = array<i64: 8, 768>}, {pipeline_mode = #tpu.pipeline_mode<synchronous>, transform_indices = @transform_1, window_bounds = array<i64: 1, 768>}, {pipeline_mode = #tpu.pipeline_mode<synchronous>, transform_indices = @transform_2, window_bounds = array<i64: 1, 768>}, {transform_indices = @transform_3, window_bounds = array<i64: 768, 1024>}, {transform_indices = @transform_4, window_bounds = array<i64: 1, 1024>}, {transform_indices = @transform_5, window_bounds = array<i64: 8, 1024>}]} {
    %c0_i32 = arith.constant 0 : i32
    %0 = arith.cmpi eq, %arg0, %c0_i32 : i32
    %1 = arith.extui %0 : i1 to i32
    %c0_i32_0 = arith.constant 0 : i32
    %2 = arith.cmpi ne, %1, %c0_i32_0 : i32
    scf.if %2 {
      %c0_8 = arith.constant 0 : index
      %c0_9 = arith.constant 0 : index
      %10 = vector.load %arg1[%c0_8, %c0_9] : memref<8x768xf32, #tpu.memory_space<vmem>>, vector<8x768xf32>
      %cst_10 = arith.constant dense<0.000000e+00> : vector<768xf32>
      %11 = vector.multi_reduction <add>, %10, %cst_10 [0] : vector<8x768xf32> to vector<768xf32>
      %12 = vector.shape_cast %11 : vector<768xf32> to vector<1x768xf32>
      %cst_11 = arith.constant 8.000000e+00 : f32
      %13 = vector.broadcast %cst_11 : f32 to vector<1x768xf32>
      %14 = arith.divf %12, %13 : vector<1x768xf32>
      %15 = vector.broadcast %14 : vector<1x768xf32> to vector<8x768xf32>
      %16 = arith.subf %10, %15 : vector<8x768xf32>
      %17 = arith.mulf %16, %16 : vector<8x768xf32>
      %cst_12 = arith.constant dense<0.000000e+00> : vector<768xf32>
      %18 = vector.multi_reduction <add>, %17, %cst_12 [0] : vector<8x768xf32> to vector<768xf32>
      %19 = vector.shape_cast %18 : vector<768xf32> to vector<1x768xf32>
      %cst_13 = arith.constant 8.000000e+00 : f32
      %20 = vector.broadcast %cst_13 : f32 to vector<1x768xf32>
      %21 = arith.divf %19, %20 : vector<1x768xf32>
      %cst_14 = arith.constant 9.99999974E-6 : f32
      %22 = vector.broadcast %cst_14 : f32 to vector<1x768xf32>
      %23 = arith.addf %21, %22 : vector<1x768xf32>
      %24 = math.rsqrt %23 : vector<1x768xf32>
      %c0_15 = arith.constant 0 : index
      %c0_16 = arith.constant 0 : index
      %25 = vector.load %arg2[%c0_15, %c0_16] : memref<1x768xf32, #tpu.memory_space<vmem>>, vector<1x768xf32>
      %26 = arith.mulf %25, %24 : vector<1x768xf32>
      %c0_17 = arith.constant 0 : index
      %c0_18 = arith.constant 0 : index
      %27 = vector.load %arg3[%c0_17, %c0_18] : memref<1x768xf32, #tpu.memory_space<vmem>>, vector<1x768xf32>
      %28 = arith.mulf %14, %26 : vector<1x768xf32>
      %29 = arith.subf %27, %28 : vector<1x768xf32>
      %30 = vector.broadcast %26 : vector<1x768xf32> to vector<8x768xf32>
      %31 = arith.mulf %10, %30 : vector<8x768xf32>
      %32 = vector.broadcast %29 : vector<1x768xf32> to vector<8x768xf32>
      %33 = arith.addf %31, %32 : vector<8x768xf32>
      %34 = arith.truncf %33 : vector<8x768xf32> to vector<8x768xbf16>
      %c0_19 = arith.constant 0 : index
      %c0_20 = arith.constant 0 : index
      %35 = vector.load %arg7[%c0_19, %c0_20] : memref<8x768xbf16, #tpu.memory_space<vmem>>, vector<8x768xbf16>
      tpu.vector_store %arg7[%c0_19, %c0_20], %34 {strides = array<i32>} : memref<8x768xbf16, #tpu.memory_space<vmem>>, vector<8x768xbf16>,
    } else {
    }
    %c0 = arith.constant 0 : index
    %c0_1 = arith.constant 0 : index
    %3 = vector.load %arg7[%c0, %c0_1] : memref<8x768xbf16, #tpu.memory_space<vmem>>, vector<8x768xbf16>
    %c0_2 = arith.constant 0 : index
    %c0_3 = arith.constant 0 : index
    %4 = vector.load %arg4[%c0_2, %c0_3] : memref<768x1024xbf16, #tpu.memory_space<vmem>>, vector<768x1024xbf16>
    %cst = arith.constant dense<0.000000e+00> : vector<8x1024xf32>
    %5 = tpu.matmul %3, %4, %cst {dimension_numbers = #tpu.dot_dimension_numbers<[1], [0], [0], [1], [0, 0, 1, 1], [], []>} : vector<8x768xbf16>, vector<768x1024xbf16>, vector<8x1024xf32> -> vector<8x1024xf32>
    %c0_4 = arith.constant 0 : index
    %c0_5 = arith.constant 0 : index
    %6 = vector.load %arg5[%c0_4, %c0_5] : memref<1x1024xf32, #tpu.memory_space<vmem>>, vector<1x1024xf32>
    %7 = vector.broadcast %6 : vector<1x1024xf32> to vector<8x1024xf32>
    %8 = arith.addf %5, %7 : vector<8x1024xf32>
    %c0_6 = arith.constant 0 : index
    %c0_7 = arith.constant 0 : index
    %9 = vector.load %arg6[%c0_6, %c0_7] : memref<8x1024xf32, #tpu.memory_space<vmem>>, vector<8x1024xf32>
    tpu.vector_store %arg6[%c0_6, %c0_7], %8 {strides = array<i32>} : memref<8x1024xf32, #tpu.memory_space<vmem>>, vector<8x1024xf32>,
    return
  }
  func.func @transform_0(%arg0: i32) -> (i32, i32) {
    %c0_i32 = arith.constant 0 : i32
    %c0_i32_0 = arith.constant 0 : i32
    %c0_i32_1 = arith.constant 0 : i32
    return %c0_i32, %c0_i32_0 : i32, i32
  }
  func.func @transform_1(%arg0: i32) -> (i32, i32) {
    %c0_i32 = arith.constant 0 : i32
    %c0_i32_0 = arith.constant 0 : i32
    %c0_i32_1 = arith.constant 0 : i32
    return %c0_i32, %c0_i32_0 : i32, i32
  }
  func.func @transform_2(%arg0: i32) -> (i32, i32) {
    %c0_i32 = arith.constant 0 : i32
    %c0_i32_0 = arith.constant 0 : i32
    %c0_i32_1 = arith.constant 0 : i32
    return %c0_i32, %c0_i32_0 : i32, i32
  }
  func.func @transform_3(%arg0: i32) -> (i32, i32) {
    %c0_i32 = arith.constant 0 : i32
    %c0_i32_0 = arith.constant 0 : i32
    return %c0_i32, %arg0 : i32, i32
  }
  func.func @transform_4(%arg0: i32) -> (i32, i32) {
    %c0_i32 = arith.constant 0 : i32
    %c0_i32_0 = arith.constant 0 : i32
    return %c0_i32, %arg0 : i32, i32
  }
  func.func @transform_5(%arg0: i32) -> (i32, i32) {
    %c0_i32 = arith.constant 0 : i32
    %c0_i32_0 = arith.constant 0 : i32
    return %c0_i32, %arg0 : i32, i32
  }
}

</mosaic_0001>

<bundles_post_ra>
// kernel: bertfc_forward.1
= control target key start
LH: loop header
LB: loop body
LE: loop exit
PB: predicated region body
PF: predicated region fallthrough
CT: control target
= control target key end

     0   :  { %s5141_s0 = inlined_call_operand.vmem [shape: f32[8,768], index: 0, kind: input, shape index: {}]   ;;  %s5142_s1 = inlined_call_operand.vmem [shape: f32[1,768], index: 1, kind: input, shape index: {}]   ;;  %s5143_s2 = inlined_call_operand.vmem [shape: f32[1,768], index: 2, kind: input, shape index: {}]   ;;  %s5144_s3 = inlined_call_operand.vmem [shape: bf16[768,1024], index: 3, kind: input, shape index: {}]   ;;  %s5145_s4 = inlined_call_operand.vmem [shape: f32[1,1024], index: 4, kind: input, shape index: {}]   ;;  %s5146_s5 = inlined_call_operand.hbm [shape: f32[8,1024], index: 5, kind: output, shape index: {}]  }
   0x1   :  { %v348_v0 = vld [vmem:[%s5144_s3] sm:$0xff]  ;;  %v349_v2 = vld [vmem:[%s5144_s3 + $0x8] sm:$0xff] }
   0x2   :  { %v352_v1 = vld [vmem:[%s5144_s3 + $0x20] sm:$0xff]  ;;  %v353_v4 = vld [vmem:[%s5144_s3 + $0x28] sm:$0xff] }
   0x3   :  { %v3239_v3 = vcombine.high %v348_v0, %v352_v1  ;;  %v3238_v5 = vcombine.low %v348_v0, %v352_v1  ;;  %v356_v6 = vld [vmem:[%s5144_s3 + $0x40] sm:$0xff]  ;;  %v3241_v8 = vcombine.high %v349_v2, %v353_v4  ;;  %v3240_v9 = vcombine.low %v349_v2, %v353_v4  ;;  %v357_v11 = vld [vmem:[%s5144_s3 + $0x48] sm:$0xff]  ;;  %v3862_v0 = vld [vmem:[%s5141_s0 + $0x10] sm:$0xff] }
   0x4   :  { %v360_v7 = vld [vmem:[%s5144_s3 + $0x60] sm:$0xff]  ;;  %v361_v12 = vld [vmem:[%s5144_s3 + $0x68] sm:$0xff]  ;;  %v3867_v1 = vld [vmem:[%s5141_s0 + $0x18] sm:$0xff] }
   0x5   :  { %v3247_v10 = vcombine.high %v356_v6, %v360_v7  ;;  %v364_v13 = vld [vmem:[%s5144_s3 + $0x80] sm:$0xff]  ;;  %2715 = vmatprep.subr.bf16.mxu0 %v3239_v3  ;;  %v3249_v14 = vcombine.high %v357_v11, %v361_v12  ;;  %v365_v16 = vld [vmem:[%s5144_s3 + $0x88] sm:$0xff]  ;;  %2838 = vmatprep.subr.bf16.mxu1 %v3241_v8  ;;  %v3246_v18 = vcombine.low %v356_v6, %v360_v7 }
   0x6   :  { %v368_v15 = vld [vmem:[%s5144_s3 + $0xa0] sm:$0xff]  ;;  %v369_v17 = vld [vmem:[%s5144_s3 + $0xa8] sm:$0xff]  ;;  %2716 = vmatpush1.bf16.msra.mxu0 %v3238_v5  ;;  %2839 = vmatpush1.bf16.msra.mxu1 %v3240_v9  ;;  %v3248_v19 = vcombine.low %v357_v11, %v361_v12  ;;  %v43_v9 = vrot.slane %v3862_v0, 4 }
   0x7   :  { %2717 = vmatprep.subr.bf16.mxu0 %v3247_v10  ;;  %v3255_v20 = vcombine.high %v364_v13, %v368_v15  ;;  %2840 = vmatprep.subr.bf16.mxu1 %v3249_v14  ;;  %v3257_v21 = vcombine.high %v365_v16, %v369_v17  ;;  %v372_v22 = vld [vmem:[%s5144_s3 + $0xc0] sm:$0xff]  ;;  %v373_v24 = vld [vmem:[%s5144_s3 + $0xc8] sm:$0xff]  ;;  %v3254_v26 = vcombine.low %v364_v13, %v368_v15  ;;  %v49_v10 = vrot.slane %v3867_v1, 4 }
   0x8   :  { %v376_v23 = vld [vmem:[%s5144_s3 + $0xe0] sm:$0xff]  ;;  %v377_v25 = vld [vmem:[%s5144_s3 + $0xe8] sm:$0xff]  ;;  %v3256_v27 = vcombine.low %v365_v16, %v369_v17 }
   0x9   :  { %v3263_v28 = vcombine.high %v372_v22, %v376_v23  ;;  %v3265_v29 = vcombine.high %v373_v24, %v377_v25  ;;  %v380_v30 = vld [vmem:[%s5144_s3 + $0x100] sm:$0xff]  ;;  %v381_v32 = vld [vmem:[%s5144_s3 + $0x108] sm:$0xff]  ;;  %v3262_v34 = vcombine.low %v372_v22, %v376_v23  ;;  %v3264_v35 = vcombine.low %v373_v24, %v377_v25 }
   0xa   :  { %2718 = vmatpush1.bf16.msra.mxu0 %v3246_v18  ;;  %2841 = vmatpush1.bf16.msra.mxu1 %v3248_v19  ;;  %v384_v31 = vld [vmem:[%s5144_s3 + $0x120] sm:$0xff]  ;;  %v385_v33 = vld [vmem:[%s5144_s3 + $0x128] sm:$0xff]  ;;  %v44_v18 = vadd.f32 %v43_v9, %v3862_v0  ;;  %v50_v19 = vadd.f32 %v49_v10, %v3867_v1 }
   0xb   :  { %2719 = vmatprep.subr.bf16.mxu0 %v3255_v20  ;;  %2842 = vmatprep.subr.bf16.mxu1 %v3257_v21  ;;  %v3271_v36 = vcombine.high %v380_v30, %v384_v31  ;;  %v3273_v37 = vcombine.high %v381_v32, %v385_v33  ;;  %v388_v38 = vld [vmem:[%s5144_s3 + $0x140] sm:$0xff]  ;;  %v389_v40 = vld [vmem:[%s5144_s3 + $0x148] sm:$0xff]  ;;  %v3270_v42 = vcombine.low %v380_v30, %v384_v31 }
   0xc   :  { %v392_v39 = vld [vmem:[%s5144_s3 + $0x160] sm:$0xff]  ;;  %v393_v41 = vld [vmem:[%s5144_s3 + $0x168] sm:$0xff]  ;;  %v3272_v43 = vcombine.low %v381_v32, %v385_v33 }
   0xd   :  { %v3279_v44 = vcombine.high %v388_v38, %v392_v39  ;;  %v396_v45 = vld [vmem:[%s5144_s3 + $0x180] sm:$0xff]  ;;  %v3281_v47 = vcombine.high %v389_v40, %v393_v41  ;;  %v397_v48 = vld [vmem:[%s5144_s3 + $0x188] sm:$0xff]  ;;  %v3278_v52 = vcombine.low %v388_v38, %v392_v39  ;;  %v3280_v53 = vcombine.low %v389_v40, %v393_v41 }
   0xe   :  { %2720 = vmatpush1.bf16.msra.mxu0 %v3254_v26  ;;  %2843 = vmatpush1.bf16.msra.mxu1 %v3256_v27  ;;  %v400_v46 = vld [vmem:[%s5144_s3 + $0x1a0] sm:$0xff]  ;;  %v401_v49 = vld [vmem:[%s5144_s3 + $0x1a8] sm:$0xff]  ;;  %v45_v26 = vrot.slane %v44_v18, 2  ;;  %v51_v27 = vrot.slane %v50_v19, 2 }
   0xf   :  { %2721 = vmatprep.subr.bf16.mxu0 %v3263_v28  ;;  %2844 = vmatprep.subr.bf16.mxu1 %v3265_v29  ;;  %v3828_v50 = vld [vmem:[%s5144_s3 + $0x1c0] sm:$0xff]  ;;  %v3287_v54 = vcombine.high %v396_v45, %v400_v46  ;;  %v3838_v55 = vld [vmem:[%s5144_s3 + $0x1c8] sm:$0xff]  ;;  %v3289_v57 = vcombine.high %v397_v48, %v401_v49  ;;  %v3286_v58 = vcombine.low %v396_v45, %v400_v46 }
  0x10   :  { %v3833_v51 = vld [vmem:[%s5144_s3 + $0x1e0] sm:$0xff]  ;;  %v3843_v56 = vld [vmem:[%s5144_s3 + $0x1e8] sm:$0xff]  ;;  %v3288_v59 = vcombine.low %v397_v48, %v401_v49 }
  0x11   :  { %v3848_v60 = vld [vmem:[%s5141_s0] sm:$0xff]  ;;  %v3853_v61 = vld [vmem:[%s5141_s0 + $0x8] sm:$0xff]  ;;  %v3295_v62 = vcombine.high %v3828_v50, %v3833_v51  ;;  %v3294_v63 = vcombine.low %v3828_v50, %v3833_v51  ;;  %v3297_v5 = vcombine.high %v3838_v55, %v3843_v56  ;;  %v3296_v12 = vcombine.low %v3838_v55, %v3843_v56 }
  0x12   :  { %2722 = vmatpush1.bf16.msra.mxu0 %v3262_v34  ;;  %2845 = vmatpush1.bf16.msra.mxu1 %v3264_v35  ;;  %v3872_v2 = vld [vmem:[%s5141_s0 + $0x20] sm:$0xff]  ;;  %v31_v3 = vrot.slane %v3848_v60, 4  ;;  %v37_v4 = vrot.slane %v3853_v61, 4  ;;  %v3891_v8 = vld [vmem:[%s5141_s0 + $0x28] sm:$0xff]  ;;  %v46_v35 = vadd.f32 %v45_v26, %v44_v18 }
  0x13   :  { %2723 = vmatprep.subr.bf16.mxu0 %v3271_v36  ;;  %2846 = vmatprep.subr.bf16.mxu1 %v3273_v37  ;;  %v3881_v6 = vld [vmem:[%s5144_s3 + $0x200] sm:$0xff]  ;;  %v55_v11 = vrot.slane %v3872_v2, 4  ;;  %v3901_v13 = vld [vmem:[%s5144_s3 + $0x208] sm:$0xff]  ;;  %v61_v17 = vrot.slane %v3891_v8, 4  ;;  %v52_v36 = vadd.f32 %v51_v27, %v50_v19 }
  0x14   :  { %v3886_v7 = vld [vmem:[%s5144_s3 + $0x220] sm:$0xff]  ;;  %v3906_v14 = vld [vmem:[%s5144_s3 + $0x228] sm:$0xff]  ;;  %v32_v15 = vadd.f32 %v31_v3, %v3848_v60  ;;  %v38_v16 = vadd.f32 %v37_v4, %v3853_v61  ;;  %v47_v45 = vrot.slane %v46_v35, 1 }
  0x15   :  { %v56_v20 = vadd.f32 %v55_v11, %v3872_v2  ;;  %v3303_v21 = vcombine.high %v3881_v6, %v3886_v7  ;;  %v62_v24 = vadd.f32 %v61_v17, %v3891_v8  ;;  %v3305_v25 = vcombine.high %v3901_v13, %v3906_v14  ;;  %v3924_v30 = vld [vmem:[%s5144_s3 + $0x240] sm:$0xff]  ;;  %v429_v3 = vld [vmem:[%s5144_s3 + $0x288] sm:$0xff] }
  0x16   :  { %2724 = vmatpush1.bf16.msra.mxu0 %v3270_v42  ;;  %2847 = vmatpush1.bf16.msra.mxu1 %v3272_v43  ;;  %v33_v22 = vrot.slane %v32_v15, 2  ;;  %v39_v23 = vrot.slane %v38_v16, 2  ;;  %v3302_v29 = vcombine.low %v3881_v6, %v3886_v7  ;;  %v3929_v31 = vld [vmem:[%s5144_s3 + $0x260] sm:$0xff]  ;;  %v3304_v38 = vcombine.low %v3901_v13, %v3906_v14  ;;  %v421_v43 = vld [vmem:[%s5144_s3 + $0x248] sm:$0xff] }
  0x17   :  { %2725 = vmatprep.subr.bf16.mxu0 %v3279_v44  ;;  %2848 = vmatprep.subr.bf16.mxu1 %v3281_v47  ;;  %v57_v28 = vrot.slane %v56_v20, 2  ;;  %v63_v34 = vrot.slane %v62_v24, 2  ;;  %v3311_v42 = vcombine.high %v3924_v30, %v3929_v31  ;;  %v425_v44 = vld [vmem:[%s5144_s3 + $0x268] sm:$0xff]  ;;  %v53_v46 = vrot.slane %v52_v36, 1  ;;  %v436_v17 = vld [vmem:[%s5144_s3 + $0x2c0] sm:$0xff] }
  0x18   :  { %v34_v32 = vadd.f32 %v33_v22, %v32_v15  ;;  %v40_v33 = vadd.f32 %v39_v23, %v38_v16  ;;  %v3310_v48 = vcombine.low %v3924_v30, %v3929_v31  ;;  %v433_v4 = vld [vmem:[%s5144_s3 + $0x2a8] sm:$0xff]  ;;  %v440_v18 = vld [vmem:[%s5144_s3 + $0x2e0] sm:$0xff] }
  0x19   :  { %v58_v37 = vadd.f32 %v57_v28, %v56_v20  ;;  %v64_v41 = vadd.f32 %v63_v34, %v62_v24  ;;  %v54_v55 = vadd.f32 %v53_v46, %v52_v36  ;;  %v3321_v16 = vcombine.high %v429_v3, %v433_v4  ;;  %v437_v23 = vld [vmem:[%s5144_s3 + $0x2c8] sm:$0xff] }
  0x1a   :  { %2726 = vmatpush1.bf16.msra.mxu0 %v3278_v52  ;;  %2849 = vmatpush1.bf16.msra.mxu1 %v3280_v53  ;;  %v35_v39 = vrot.slane %v34_v32, 1  ;;  %v41_v40 = vrot.slane %v40_v33, 1  ;;  %v3946_v52 = vld [vmem:[%s5144_s3 + $0x280] sm:$0xff]  ;;  %v441_v24 = vld [vmem:[%s5144_s3 + $0x2e8] sm:$0xff]  ;;  %v3320_v28 = vcombine.low %v429_v3, %v433_v4 }
  0x1b   :  { %2727 = vmatprep.subr.bf16.mxu0 %v3287_v54  ;;  %2850 = vmatprep.subr.bf16.mxu1 %v3289_v57  ;;  %v59_v47 = vrot.slane %v58_v37, 1  ;;  %v65_v51 = vrot.slane %v64_v41, 1  ;;  %v432_v53 = vld [vmem:[%s5144_s3 + $0x2a0] sm:$0xff]  ;;  %v48_v54 = vadd.f32 %v47_v45, %v46_v35  ;;  %v3313_v57 = vcombine.high %v421_v43, %v425_v44 }
  0x1c   :  { %v36_v49 = vadd.f32 %v35_v39, %v34_v32  ;;  %v42_v50 = vadd.f32 %v41_v40, %v40_v33  ;;  %v3963_v6 = vmul.f32 0.125, %v54_v55  ;;  %v3319_v9 = vcombine.high %v3946_v52, %v432_v53 }
  0x1d   :  { %v60_v56 = vadd.f32 %v59_v47, %v58_v37  ;;  %v3318_v22 = vcombine.low %v3946_v52, %v432_v53  ;;  %v3327_v32 = vcombine.high %v436_v17, %v440_v18  ;;  %v3329_v36 = vcombine.high %v437_v23, %v441_v24  ;;  %v444_v37 = vld [vmem:[%s5144_s3 + $0x300] sm:$0xff] }
  0x1e   :  { %2728 = vmatpush1.bf16.msra.mxu0 %v3286_v58  ;;  %2851 = vmatpush1.bf16.msra.mxu1 %v3288_v59  ;;  %v66_v58 = vadd.f32 %v65_v51, %v64_v41  ;;  %v3951_v59 = vmul.f32 0.125, %v36_v49  ;;  %v77_v14 = vsub.f32 %v3867_v1, %v3963_v6 }
  0x1f   :  { %2729 = vmatprep.subr.bf16.mxu0 %v3295_v62  ;;  %2852 = vmatprep.subr.bf16.mxu1 %v3297_v5  ;;  %v3953_v62 = vmul.f32 0.125, %v42_v50  ;;  %v3961_v5 = vmul.f32 0.125, %v48_v54  ;;  %v3965_v7 = vmul.f32 0.125, %v60_v56 }
  0x20   :  { %v3968_v10 = vmul.f32 0.125, %v66_v58  ;;  %v74_v11 = vsub.f32 %v3848_v60, %v3951_v59  ;;  %v83_v26 = vmul.f32 %v77_v14, %v77_v14  ;;  %v456_v58 = vld [vmem:[%s5144_s3 + $0x360] sm:$0xff] }
  0x21   :  { %v76_v13 = vsub.f32 %v3862_v0, %v3961_v5  ;;  %v78_v15 = vsub.f32 %v3872_v2, %v3965_v7 }
  0x22   :  { %2730 = vmatpush1.bf16.msra.mxu0 %v3294_v63  ;;  %2853 = vmatpush1.bf16.msra.mxu1 %v3296_v12  ;;  %v3312_v63 = vcombine.low %v421_v43, %v425_v44  ;;  %v75_v12 = vsub.f32 %v3853_v61, %v3953_v62  ;;  %v79_v19 = vsub.f32 %v3891_v8, %v3968_v10  ;;  %v104_v34 = vrot.slane %v83_v26, 4  ;;  %v445_v43 = vld [vmem:[%s5144_s3 + $0x308] sm:$0xff] }
  0x23   :  { %2731 = vmatprep.subr.bf16.mxu0 %v3303_v21  ;;  %2854 = vmatprep.subr.bf16.mxu1 %v3305_v25  ;;  %v80_v20 = vmul.f32 %v74_v11, %v74_v11  ;;  %v82_v25 = vmul.f32 %v76_v13, %v76_v13  ;;  %v84_v27 = vmul.f32 %v78_v15, %v78_v15  ;;  %v449_v44 = vld [vmem:[%s5144_s3 + $0x328] sm:$0xff] }
  0x24   :  { %v81_v21 = vmul.f32 %v75_v12, %v75_v12  ;;  %v105_v46 = vadd.f32 %v104_v34, %v83_v26  ;;  %v3337_v56 = vcombine.high %v445_v43, %v449_v44  ;;  %v453_v11 = vld [vmem:[%s5144_s3 + $0x348] sm:$0xff]  ;;  %v464_v26 = vld [vmem:[%s5144_s3 + $0x3a0] sm:$0xff] }
  0x25   :  { %v86_v30 = vrot.slane %v80_v20, 4  ;;  %v98_v33 = vrot.slane %v82_v25, 4  ;;  %v110_v35 = vrot.slane %v84_v27, 4  ;;  %v457_v12 = vld [vmem:[%s5144_s3 + $0x368] sm:$0xff] }
  0x26   :  { %2732 = vmatpush1.bf16.msra.mxu0 %v3302_v29  ;;  %2855 = vmatpush1.bf16.msra.mxu1 %v3304_v38  ;;  %v85_v29 = vmul.f32 %v79_v19, %v79_v19  ;;  %v92_v31 = vrot.slane %v81_v21, 4  ;;  %v448_v38 = vld [vmem:[%s5144_s3 + $0x320] sm:$0xff]  ;;  %v106_v54 = vrot.slane %v105_v46, 2 }
  0x27   :  { %2733 = vmatprep.subr.bf16.mxu0 %v3311_v42  ;;  %2856 = vmatprep.subr.bf16.mxu1 %v3313_v57  ;;  %v87_v39 = vadd.f32 %v86_v30, %v80_v20  ;;  %v3326_v42 = vcombine.low %v436_v17, %v440_v18  ;;  %v99_v45 = vadd.f32 %v98_v33, %v82_v25  ;;  %v452_v57 = vld [vmem:[%s5144_s3 + $0x340] sm:$0xff] }
  0x28   :  { %v93_v40 = vadd.f32 %v92_v31, %v81_v21  ;;  %v116_v41 = vrot.slane %v85_v29, 4  ;;  %v111_v47 = vadd.f32 %v110_v35, %v84_v27  ;;  %v3335_v52 = vcombine.high %v444_v37, %v448_v38  ;;  %v460_v25 = vld [vmem:[%s5144_s3 + $0x380] sm:$0xff]  ;;  %v461_v31 = vld [vmem:[%s5144_s3 + $0x388] sm:$0xff] }
  0x29   :  { %v88_v49 = vrot.slane %v87_v39, 2  ;;  %v100_v53 = vrot.slane %v99_v45, 2  ;;  %v107_v14 = vadd.f32 %v106_v54, %v105_v46  ;;  %v3343_v20 = vcombine.high %v452_v57, %v456_v58 }
  0x2a   :  { %2734 = vmatpush1.bf16.msra.mxu0 %v3310_v48  ;;  %2857 = vmatpush1.bf16.msra.mxu1 %v3312_v63  ;;  %v3328_v48 = vcombine.low %v437_v23, %v441_v24  ;;  %v94_v50 = vrot.slane %v93_v40, 2  ;;  %v117_v51 = vadd.f32 %v116_v41, %v85_v29  ;;  %v112_v55 = vrot.slane %v111_v47, 2 }
  0x2b   :  { %2735 = vmatprep.subr.bf16.mxu0 %v3319_v9  ;;  %2858 = vmatprep.subr.bf16.mxu1 %v3321_v16  ;;  %v89_v63 = vadd.f32 %v88_v49, %v87_v39  ;;  %v3334_v9 = vcombine.low %v444_v37, %v448_v38  ;;  %v101_v13 = vadd.f32 %v100_v53, %v99_v45 }
  0x2c   :  { %v95_v3 = vadd.f32 %v94_v50, %v93_v40  ;;  %v118_v4 = vrot.slane %v117_v51, 2  ;;  %v113_v15 = vadd.f32 %v112_v55, %v111_v47  ;;  %v3336_v16 = vcombine.low %v445_v43, %v449_v44 }
  0x2d   :  { %v90_v17 = vrot.slane %v89_v63, 1  ;;  %v102_v21 = vrot.slane %v101_v13, 1  ;;  %v3345_v24 = vcombine.high %v453_v11, %v457_v12  ;;  %v3342_v30 = vcombine.low %v452_v57, %v456_v58 }
  0x2e   :  { %2736 = vmatpush1.bf16.msra.mxu0 %v3318_v22  ;;  %2859 = vmatpush1.bf16.msra.mxu1 %v3320_v28  ;;  %v96_v18 = vrot.slane %v95_v3, 1  ;;  %v119_v19 = vadd.f32 %v118_v4, %v117_v51  ;;  %v108_v22 = vrot.slane %v107_v14, 1  ;;  %v114_v23 = vrot.slane %v113_v15, 1 }
  0x2f   :  { %2737 = vmatprep.subr.bf16.mxu0 %v3327_v32  ;;  %2860 = vmatprep.subr.bf16.mxu1 %v3329_v36  ;;  %v91_v27 = vadd.f32 %v90_v17, %v89_v63  ;;  %v465_v32 = vld [vmem:[%s5144_s3 + $0x3a8] sm:$0xff]  ;;  %v103_v33 = vadd.f32 %v102_v21, %v101_v13 }
  0x30   :  { %v97_v28 = vadd.f32 %v96_v18, %v95_v3  ;;  %v120_v29 = vrot.slane %v119_v19, 1  ;;  %v109_v34 = vadd.f32 %v108_v22, %v107_v14  ;;  %v115_v35 = vadd.f32 %v114_v23, %v113_v15 }
  0x32   :  { %2738 = vmatpush1.bf16.msra.mxu0 %v3326_v42  ;;  %2861 = vmatpush1.bf16.msra.mxu1 %v3328_v48 }
  0x33   :  { %2739 = vmatprep.subr.bf16.mxu0 %v3335_v52  ;;  %2862 = vmatprep.subr.bf16.mxu1 %v3337_v56 }
  0x34   :  { %10 = vsyncpa [#allocation4], 0  ;;  %v3344_v36 = vcombine.low %v453_v11, %v457_v12  ;;  %v121_v37 = vadd.f32 %v120_v29, %v119_v19  ;;  %v122_v38 = vmul.f32 0.125, %v91_v27  ;;  %v123_v39 = vmul.f32 0.125, %v97_v28  ;;  %v468_v41 = vld [vmem:[%s5144_s3 + $0x3c0] sm:$0xff]  ;;  %v469_v50 = vld [vmem:[%s5144_s3 + $0x3c8] sm:$0xff] }
  0x35   :  { %v3351_v40 = vcombine.high %v460_v25, %v464_v26  ;;  %v124_v42 = vmul.f32 0.125, %v103_v33  ;;  %v125_v43 = vmul.f32 0.125, %v109_v34  ;;  %v126_v44 = vmul.f32 0.125, %v115_v35  ;;  %v472_v46 = vld [vmem:[%s5144_s3 + $0x3e0] sm:$0xff]  ;;  %v473_v51 = vld [vmem:[%s5144_s3 + $0x3e8] sm:$0xff] }
  0x36   :  { %2740 = vmatpush1.bf16.msra.mxu0 %v3334_v9  ;;  %2863 = vmatpush1.bf16.msra.mxu1 %v3336_v16  ;;  %v3353_v45 = vcombine.high %v461_v31, %v465_v32  ;;  %v127_v47 = vmul.f32 0.125, %v121_v37  ;;  %v128_v48 = vadd.f32 1e-05, %v122_v38  ;;  %v129_v49 = vadd.f32 1e-05, %v123_v39  ;;  %v4046_v11 = vld [vmem:[%s5144_s3 + $0x400] sm:$0xff] }
  0x37   :  { %2741 = vmatprep.subr.bf16.mxu0 %v3343_v20  ;;  %2864 = vmatprep.subr.bf16.mxu1 %v3345_v24  ;;  %v130_v52 = vadd.f32 1e-05, %v124_v42  ;;  %v131_v53 = vadd.f32 1e-05, %v125_v43  ;;  %v3350_v54 = vcombine.low %v460_v25, %v464_v26  ;;  %v132_v55 = vadd.f32 1e-05, %v126_v44 }
  0x38   :  { %3673 = vrsqrt.f32 %v128_v48  ;;  %v3352_v56 = vcombine.low %v461_v31, %v465_v32  ;;  %v3359_v57 = vcombine.high %v468_v41, %v472_v46  ;;  %v133_v58 = vadd.f32 1e-05, %v127_v47  ;;  %v4051_v12 = vld [vmem:[%s5144_s3 + $0x420] sm:$0xff]  ;;  %v4056_v13 = vld [vmem:[%s5144_s3 + $0x408] sm:$0xff] }
  0x39   :  { %3675 = vrsqrt.f32 %v129_v49  ;;  %v3361_v63 = vcombine.high %v469_v50, %v473_v51  ;;  %v3709_v3 = vmov 1966171168   ;;  %v153_v9 = vlaneseq  ;;  %v4061_v14 = vld [vmem:[%s5144_s3 + $0x428] sm:$0xff]  ;;  %v140_v37 = vld [vmem:[%s5142_s1] sm:$0x3f] }
  0x3a   :  { %2742 = vmatpush1.bf16.msra.mxu0 %v3342_v30  ;;  %2865 = vmatpush1.bf16.msra.mxu1 %v3344_v36  ;;  %3677 = vrsqrt.f32 %v130_v52  ;;  %v151_v4 = vunpack.c.l.s4 %v3709_v3  ;;  %v3358_v15 = vcombine.low %v468_v41, %v472_v46  ;;  %v3360_v16 = vcombine.low %v469_v50, %v473_v51 }
  0x3b   :  { %2743 = vmatprep.subr.bf16.mxu0 %v3351_v40  ;;  %2866 = vmatprep.subr.bf16.mxu1 %v3353_v45  ;;  %3679 = vrsqrt.f32 %v131_v53  ;;  %v3367_v17 = vcombine.high %v4046_v11, %v4051_v12  ;;  %v4065_v19 = vshrl.u32 %v153_v9, 7  ;;  %v3369_v20 = vcombine.high %v4056_v13, %v4061_v14 }
  0x3c   :  { %3681 = vrsqrt.f32 %v132_v55  ;;  %v152_v18 = vunpack.c.0.s8 %v151_v4 }
  0x3d   :  { %3683 = vrsqrt.f32 %v133_v58  ;;  %v4074_v38 = vsub.s32 0, %v4065_v19  ;;  %v4077_v40 = vsub.s32 1, %v4065_v19  ;;  %v4080_v41 = vsub.s32 2, %v4065_v19 }
  0x3e   :  { %2744 = vmatpush1.bf16.msra.mxu0 %v3350_v54  ;;  %2867 = vmatpush1.bf16.msra.mxu1 %v3352_v56  ;;  %v155_v22 = vsub.s32 %v152_v18, %v4065_v19  ;;  %v4083_v42 = vsub.s32 3, %v4065_v19  ;;  %v4086_v43 = vsub.s32 4, %v4065_v19  ;;  %v4089_v44 = vsub.s32 5, %v4065_v19 }
  0x3f   :  { %2745 = vmatprep.subr.bf16.mxu0 %v3359_v57  ;;  %2868 = vmatprep.subr.bf16.mxu1 %v3361_v63 }
  0x42   :  { %2746 = vmatpush1.bf16.msra.mxu0 %v3358_v15  ;;  %2869 = vmatpush1.bf16.msra.mxu1 %v3360_v16  ;;  %v3674_v21 = vpop.eup %3673 }
  0x43   :  { %2756 = vmatprep.subr.bf16.mxu0 %v3367_v17  ;;  %2879 = vmatprep.subr.bf16.mxu1 %v3369_v20  ;;  %v3676_v23 = vpop.eup %3675 }
  0x44   :  { %v3678_v24 = vpop.eup %3677  ;;  %v147_v25 = vcombine.low %v3674_v21, %v3676_v23 }
  0x45   :  { %v3680_v26 = vpop.eup %3679 }
  0x46   :  { %v3682_v27 = vpop.eup %3681  ;;  %v148_v28 = vcombine.low %v3678_v24, %v3680_v26  ;;  %v156_v29 = vrot.slane %v147_v25, %v155_v22  ;;  %v484_v24 = vld [vmem:[%s5144_s3 + $0x440] sm:$0xff] }
  0x47   :  { %v3684_v30 = vpop.eup %3683 }
  0x48   :  { %v149_v31 = vcombine.low %v3682_v27, %v3684_v30  ;;  %v163_v32 = vrot.slane %v148_v28, %v155_v22  ;;  %v485_v27 = vld [vmem:[%s5144_s3 + $0x448] sm:$0xff] }
  0x49   :  { %v489_v28 = vld [vmem:[%s5144_s3 + $0x468] sm:$0xff] }
  0x4a   :  { %v170_v33 = vrot.slane %v149_v31, %v155_v22  ;;  %v171_v34 = vcombine.low %v156_v29, %v163_v32 }
  0x4c   :  { %v178_v35 = vrot.slane %v171_v34, %v155_v22  ;;  %v185_v36 = vrot.slane %v170_v33, %v155_v22  ;;  %v3366_v33 = vcombine.low %v4046_v11, %v4051_v12  ;;  %v3368_v34 = vcombine.low %v4056_v13, %v4061_v14  ;;  %v493_v11 = vld [vmem:[%s5144_s3 + $0x488] sm:$0xff] }
  0x4d   :  { %v497_v12 = vld [vmem:[%s5144_s3 + $0x4a8] sm:$0xff] }
  0x4e   :  { %v186_v39 = vcombine.low %v178_v35, %v185_v36 }
  0x50   :  { %v188_v45 = vmul.f32 %v186_v39, %v140_v37  ;;  %v3377_v37 = vcombine.high %v485_v27, %v489_v28  ;;  %v492_v39 = vld [vmem:[%s5144_s3 + $0x480] sm:$0xff] }
  0x52   :  { %v194_v46 = vrot.slane %v188_v45, %v4074_v38  ;;  %v198_v47 = vrot.slane %v188_v45, %v4077_v40  ;;  %v202_v48 = vrot.slane %v188_v45, %v4080_v41  ;;  %v206_v49 = vrot.slane %v188_v45, %v4083_v42 }
  0x53   :  { %v210_v50 = vrot.slane %v188_v45, %v4086_v43  ;;  %v214_v51 = vrot.slane %v188_v45, %v4089_v44 }
  0x54   :  { %v221_v52 = vmul.f32 %v194_v46, %v3951_v59  ;;  %v222_v53 = vmul.f32 %v198_v47, %v3953_v62  ;;  %v223_v54 = vmul.f32 %v202_v48, %v3961_v5  ;;  %v224_v55 = vmul.f32 %v206_v49, %v3963_v6  ;;  %v189_v62 = vld [vmem:[%s5143_s2] sm:$0x3f] }
  0x55   :  { %v225_v56 = vmul.f32 %v210_v50, %v3965_v7  ;;  %v226_v57 = vmul.f32 %v214_v51, %v3968_v10  ;;  %v277_v3 = vmul.f32 %v202_v48, %v3862_v0  ;;  %v276_v7 = vmul.f32 %v198_v47, %v3853_v61 }
  0x56   :  { %v233_v58 = vcombine.low %v221_v52, %v222_v53  ;;  %v234_v63 = vcombine.low %v223_v54, %v224_v55  ;;  %v275_v10 = vmul.f32 %v194_v46, %v3848_v60  ;;  %v278_v20 = vmul.f32 %v206_v49, %v3867_v1  ;;  %v488_v1 = vld [vmem:[%s5144_s3 + $0x460] sm:$0xff]  ;;  %v501_v52 = vld [vmem:[%s5144_s3 + $0x4c8] sm:$0xff] }
  0x57   :  { %v235_v4 = vcombine.low %v225_v56, %v226_v57  ;;  %v280_v25 = vmul.f32 %v214_v51, %v3891_v8  ;;  %v279_v31 = vmul.f32 %v210_v50, %v3872_v2  ;;  %v3375_v36 = vcombine.high %v484_v24, %v488_v1  ;;  %v496_v2 = vld [vmem:[%s5144_s3 + $0x4a0] sm:$0xff]  ;;  %v505_v53 = vld [vmem:[%s5144_s3 + $0x4e8] sm:$0xff] }
  0x58   :  { %v242_v9 = vrot.slane %v233_v58, %v155_v22  ;;  %v249_v15 = vrot.slane %v234_v63, %v155_v22  ;;  %v3374_v46 = vcombine.low %v484_v24, %v488_v1  ;;  %v3376_v47 = vcombine.low %v485_v27, %v489_v28  ;;  %v500_v50 = vld [vmem:[%s5144_s3 + $0x4c0] sm:$0xff]  ;;  %v533_v27 = vld [vmem:[%s5144_s3 + $0x5c8] sm:$0xff] }
  0x59   :  { %v256_v16 = vrot.slane %v235_v4, %v155_v22  ;;  %v3383_v48 = vcombine.high %v492_v39, %v496_v2  ;;  %v3385_v49 = vcombine.high %v493_v11, %v497_v12  ;;  %v504_v51 = vld [vmem:[%s5144_s3 + $0x4e0] sm:$0xff]  ;;  %v3382_v54 = vcombine.low %v492_v39, %v496_v2  ;;  %v513_v4 = vld [vmem:[%s5144_s3 + $0x528] sm:$0xff] }
  0x5a   :  { %v257_v17 = vcombine.low %v242_v9, %v249_v15  ;;  %v3384_v55 = vcombine.low %v493_v11, %v497_v12  ;;  %v3391_v56 = vcombine.high %v500_v50, %v504_v51  ;;  %v3393_v57 = vcombine.high %v501_v52, %v505_v53  ;;  %v508_v58 = vld [vmem:[%s5144_s3 + $0x500] sm:$0xff]  ;;  %v537_v28 = vld [vmem:[%s5144_s3 + $0x5e8] sm:$0xff] }
  0x5b   :  { %v271_v59 = vrot.slane %v256_v16, %v155_v22  ;;  %v512_v63 = vld [vmem:[%s5144_s3 + $0x520] sm:$0xff]  ;;  %v3390_v9 = vcombine.low %v500_v50, %v504_v51  ;;  %v3392_v15 = vcombine.low %v501_v52, %v505_v53  ;;  %v541_v39 = vld [vmem:[%s5144_s3 + $0x608] sm:$0xff]  ;;  %v3424_v11 = vcombine.low %v533_v27, %v537_v28 }
  0x5c   :  { %v264_v18 = vrot.slane %v257_v17, %v155_v22  ;;  %v3399_v16 = vcombine.high %v508_v58, %v512_v63  ;;  %v536_v1 = vld [vmem:[%s5144_s3 + $0x5e0] sm:$0xff]  ;;  %v553_v50 = vld [vmem:[%s5144_s3 + $0x668] sm:$0xff] }
  0x5e   :  { %v272_v5 = vcombine.low %v264_v18, %v271_v59  ;;  %v516_v59 = vld [vmem:[%s5144_s3 + $0x540] sm:$0xff] }
  0x5f   :  { %v520_v18 = vld [vmem:[%s5144_s3 + $0x560] sm:$0xff] }
  0x60   :  { %v274_v6 = vsub.f32 %v189_v62, %v272_v5  ;;  %v517_v62 = vld [vmem:[%s5144_s3 + $0x548] sm:$0xff]  ;;  %v3406_v24 = vcombine.low %v516_v59, %v520_v18 }
  0x61   :  { %v521_v5 = vld [vmem:[%s5144_s3 + $0x568] sm:$0xff] }
  0x62   :  { %v289_v0 = vrot.slane %v274_v6, %v4077_v40  ;;  %v285_v21 = vrot.slane %v274_v6, %v4074_v38  ;;  %v297_v23 = vrot.slane %v274_v6, %v4083_v42  ;;  %v293_v22 = vrot.slane %v274_v6, %v4080_v41 }
  0x63   :  { %v305_v61 = vrot.slane %v274_v6, %v4089_v44  ;;  %v301_v45 = vrot.slane %v274_v6, %v4086_v43  ;;  %v3398_v6 = vcombine.low %v508_v58, %v512_v63  ;;  %v561_v58 = vld [vmem:[%s5144_s3 + $0x6a8] sm:$0xff] }
  0x64   :  { %v313_v26 = vadd.f32 %v289_v0, %v276_v7  ;;  %v312_v60 = vadd.f32 %v285_v21, %v275_v10  ;;  %v315_v29 = vadd.f32 %v297_v23, %v278_v20  ;;  %v4128_v30 = vadd.f32 %v293_v22, %v277_v3  ;;  %v509_v3 = vld [vmem:[%s5144_s3 + $0x508] sm:$0xff]  ;;  %v524_v0 = vld [vmem:[%s5144_s3 + $0x580] sm:$0xff] }
  0x65   :  { %v4130_v8 = vadd.f32 %v305_v61, %v280_v25  ;;  %v4160_v14 = vadd.f32 %v301_v45, %v279_v31  ;;  %v3401_v17 = vcombine.high %v509_v3, %v513_v4  ;;  %v3400_v7 = vcombine.low %v509_v3, %v513_v4  ;;  %v528_v21 = vld [vmem:[%s5144_s3 + $0x5a0] sm:$0xff]  ;;  %v525_v23 = vld [vmem:[%s5144_s3 + $0x588] sm:$0xff] }
  0x66   :  { %v4133_v32 = vpack.c.bf16 %v313_v26, %v313_v26  ;;  %v4139_v35 = vpack.c.bf16 %v312_v60, %v312_v60  ;;  %v4156_v13 = vpack.c.bf16 %v315_v29, %v315_v29  ;;  %v3407_v10 = vcombine.high %v516_v59, %v520_v18  ;;  %v529_v22 = vld [vmem:[%s5144_s3 + $0x5a8] sm:$0xff]  ;;  %v532_v60 = vld [vmem:[%s5144_s3 + $0x5c0] sm:$0xff] }
  0x67   :  { %v3409_v20 = vcombine.high %v517_v62, %v521_v5  ;;  %v3408_v25 = vcombine.low %v517_v62, %v521_v5  ;;  %v3415_v61 = vcombine.high %v524_v0, %v528_v21  ;;  %v3417_v26 = vcombine.high %v525_v23, %v529_v22  ;;  %v545_v45 = vld [vmem:[%s5144_s3 + $0x628] sm:$0xff] }
  0x68   :  { %2747 = vmatprep.mubr.bf16.mxu0 %v4133_v32  ;;  %2870 = vmatprep.mubr.bf16.mxu1 %v4133_v32  ;;  %v3414_v29 = vcombine.low %v524_v0, %v528_v21  ;;  %v3416_v31 = vcombine.low %v525_v23, %v529_v22  ;;  %v3422_v2 = vcombine.low %v532_v60, %v536_v1  ;;  %v569_v59 = vld [vmem:[%s5144_s3 + $0x6e8] sm:$0xff] }
  0x69   :  { %2748 = vmatmul.mubr.bf16.vlgmr.msra.gmra.mrb[0].mxu0 %v4139_v35  ;;  %2871 = vmatmul.mubr.bf16.vlgmr.msra.gmra.mrb[0].mxu1 %v4139_v35  ;;  %v3432_v52 = vcombine.low %v541_v39, %v545_v45  ;;  %v577_v0 = vld [vmem:[%s5144_s3 + $0x728] sm:$0xff] }
  0x6a   :  { %2757 = vmatpush1.bf16.msra.mxu0 %v3366_v33  ;;  %2880 = vmatpush1.bf16.msra.mxu1 %v3368_v34  ;;  %v3423_v33 = vcombine.high %v532_v60, %v536_v1  ;;  %v3425_v34 = vcombine.high %v533_v27, %v537_v28  ;;  %v585_v60 = vld [vmem:[%s5144_s3 + $0x768] sm:$0xff] }
  0x6b   :  { %2758 = vmatprep.subr.bf16.mxu0 %v3375_v36  ;;  %2881 = vmatprep.subr.bf16.mxu1 %v3377_v37  ;;  %v540_v36 = vld [vmem:[%s5144_s3 + $0x600] sm:$0xff] }
  0x6c   :  { %2788 = vmatprep.mubr.bf16.mxu0 %v4156_v13  ;;  %2911 = vmatprep.mubr.bf16.mxu1 %v4156_v13  ;;  %v544_v37 = vld [vmem:[%s5144_s3 + $0x620] sm:$0xff] }
  0x6d   :  { %v3431_v12 = vcombine.high %v540_v36, %v544_v37  ;;  %v3430_v51 = vcombine.low %v540_v36, %v544_v37  ;;  %v593_v36 = vld [vmem:[%s5144_s3 + $0x7a8] sm:$0xff] }
  0x6e   :  { %2759 = vmatpush1.bf16.msra.mxu0 %v3374_v46  ;;  %2882 = vmatpush1.bf16.msra.mxu1 %v3376_v47  ;;  %v3433_v46 = vcombine.high %v541_v39, %v545_v45  ;;  %v548_v47 = vld [vmem:[%s5144_s3 + $0x640] sm:$0xff] }
  0x6f   :  { %2760 = vmatprep.subr.bf16.mxu0 %v3383_v48  ;;  %2883 = vmatprep.subr.bf16.mxu1 %v3385_v49  ;;  %v552_v48 = vld [vmem:[%s5144_s3 + $0x660] sm:$0xff]  ;;  %v549_v49 = vld [vmem:[%s5144_s3 + $0x648] sm:$0xff] }
  0x70   :  { %v3439_v53 = vcombine.high %v548_v47, %v552_v48  ;;  %v3438_v63 = vcombine.low %v548_v47, %v552_v48  ;;  %v3440_v3 = vcombine.low %v549_v49, %v553_v50  ;;  %v601_v47 = vld [vmem:[%s5144_s3 + $0x7e8] sm:$0xff] }
  0x72   :  { %2761 = vmatpush1.bf16.msra.mxu0 %v3382_v54  ;;  %2884 = vmatpush1.bf16.msra.mxu1 %v3384_v55  ;;  %v3441_v54 = vcombine.high %v549_v49, %v553_v50  ;;  %v556_v55 = vld [vmem:[%s5144_s3 + $0x680] sm:$0xff] }
  0x73   :  { %2762 = vmatprep.subr.bf16.mxu0 %v3391_v56  ;;  %2885 = vmatprep.subr.bf16.mxu1 %v3393_v57  ;;  %v560_v56 = vld [vmem:[%s5144_s3 + $0x6a0] sm:$0xff]  ;;  %v557_v57 = vld [vmem:[%s5144_s3 + $0x688] sm:$0xff] }
  0x74   :  { %v3447_v4 = vcombine.high %v556_v55, %v560_v56  ;;  %v3446_v18 = vcombine.low %v556_v55, %v560_v56  ;;  %v3448_v62 = vcombine.low %v557_v57, %v561_v58  ;;  %v609_v55 = vld [vmem:[%s5144_s3 + $0x828] sm:$0xff] }
  0x76   :  { %2763 = vmatpush1.bf16.msra.mxu0 %v3390_v9  ;;  %2886 = vmatpush1.bf16.msra.mxu1 %v3392_v15  ;;  %v3449_v9 = vcombine.high %v557_v57, %v561_v58  ;;  %v564_v15 = vld [vmem:[%s5144_s3 + $0x6c0] sm:$0xff] }
  0x77   :  { %2764 = vmatprep.subr.bf16.mxu0 %v3399_v16  ;;  %2887 = vmatprep.subr.bf16.mxu1 %v3401_v17  ;;  %v568_v16 = vld [vmem:[%s5144_s3 + $0x6e0] sm:$0xff]  ;;  %v565_v17 = vld [vmem:[%s5144_s3 + $0x6c8] sm:$0xff] }
  0x78   :  { %v3455_v5 = vcombine.high %v564_v15, %v568_v16  ;;  %v3454_v21 = vcombine.low %v564_v15, %v568_v16  ;;  %v3456_v23 = vcombine.low %v565_v17, %v569_v59  ;;  %v617_v15 = vld [vmem:[%s5144_s3 + $0x868] sm:$0xff]  ;;  %v4346_v16 = vpack.c.bf16 %v4128_v30, %v4128_v30 }
  0x79   :  { %v621_v30 = vld [vmem:[%s5144_s3 + $0x888] sm:$0xff] }
  0x7a   :  { %2765 = vmatpush1.bf16.msra.mxu0 %v3398_v6  ;;  %2888 = vmatpush1.bf16.msra.mxu1 %v3400_v7  ;;  %v3457_v6 = vcombine.high %v565_v17, %v569_v59  ;;  %v572_v7 = vld [vmem:[%s5144_s3 + $0x700] sm:$0xff] }
  0x7b   :  { %2766 = vmatprep.subr.bf16.mxu0 %v3407_v10  ;;  %2889 = vmatprep.subr.bf16.mxu1 %v3409_v20  ;;  %v576_v10 = vld [vmem:[%s5144_s3 + $0x720] sm:$0xff]  ;;  %v573_v20 = vld [vmem:[%s5144_s3 + $0x708] sm:$0xff] }
  0x7c   :  { %v3463_v22 = vcombine.high %v572_v7, %v576_v10  ;;  %v3462_v1 = vcombine.low %v572_v7, %v576_v10  ;;  %v3464_v27 = vcombine.low %v573_v20, %v577_v0  ;;  %v625_v7 = vld [vmem:[%s5144_s3 + $0x8a8] sm:$0xff]  ;;  %v4362_v10 = vpack.c.bf16 %v4130_v8, %v4130_v8  ;;  %v632_v8 = vld [vmem:[%s5144_s3 + $0x8e0] sm:$0xff] }
  0x7e   :  { %2767 = vmatpush1.bf16.msra.mxu0 %v3406_v24  ;;  %2890 = vmatpush1.bf16.msra.mxu1 %v3408_v25  ;;  %v3465_v24 = vcombine.high %v573_v20, %v577_v0  ;;  %v580_v25 = vld [vmem:[%s5144_s3 + $0x740] sm:$0xff] }
  0x7f   :  { %2768 = vmatprep.subr.bf16.mxu0 %v3415_v61  ;;  %2891 = vmatprep.subr.bf16.mxu1 %v3417_v26  ;;  %v584_v61 = vld [vmem:[%s5144_s3 + $0x760] sm:$0xff]  ;;  %v581_v26 = vld [vmem:[%s5144_s3 + $0x748] sm:$0xff] }
  0x80   :  { %v3471_v28 = vcombine.high %v580_v25, %v584_v61  ;;  %v3470_v37 = vcombine.low %v580_v25, %v584_v61  ;;  %v3472_v39 = vcombine.low %v581_v26, %v585_v60  ;;  %v633_v25 = vld [vmem:[%s5144_s3 + $0x8e8] sm:$0xff] }
  0x82   :  { %2769 = vmatpush1.bf16.msra.mxu0 %v3414_v29  ;;  %2892 = vmatpush1.bf16.msra.mxu1 %v3416_v31  ;;  %v3473_v29 = vcombine.high %v581_v26, %v585_v60  ;;  %v588_v31 = vld [vmem:[%s5144_s3 + $0x780] sm:$0xff]  ;;  %v3512_v26 = vcombine.low %v621_v30, %v625_v7 }
  0x83   :  { %2770 = vmatprep.subr.bf16.mxu0 %v3423_v33  ;;  %2893 = vmatprep.subr.bf16.mxu1 %v3425_v34  ;;  %v592_v33 = vld [vmem:[%s5144_s3 + $0x7a0] sm:$0xff]  ;;  %v589_v34 = vld [vmem:[%s5144_s3 + $0x788] sm:$0xff] }
  0x84   :  { %v3479_v45 = vcombine.high %v588_v31, %v592_v33  ;;  %v3478_v48 = vcombine.low %v588_v31, %v592_v33  ;;  %v3480_v49 = vcombine.low %v589_v34, %v593_v36  ;;  %v641_v31 = vld [vmem:[%s5144_s3 + $0x928] sm:$0xff] }
  0x86   :  { %2771 = vmatpush1.bf16.msra.mxu0 %v3422_v2  ;;  %2894 = vmatpush1.bf16.msra.mxu1 %v3424_v11  ;;  %v3481_v2 = vcombine.high %v589_v34, %v593_v36  ;;  %v596_v11 = vld [vmem:[%s5144_s3 + $0x7c0] sm:$0xff] }
  0x87   :  { %2772 = vmatprep.subr.bf16.mxu0 %v3431_v12  ;;  %2895 = vmatprep.subr.bf16.mxu1 %v3433_v46  ;;  %v600_v12 = vld [vmem:[%s5144_s3 + $0x7e0] sm:$0xff]  ;;  %v597_v46 = vld [vmem:[%s5144_s3 + $0x7c8] sm:$0xff] }
  0x88   :  { %v3487_v50 = vcombine.high %v596_v11, %v600_v12  ;;  %v3486_v56 = vcombine.low %v596_v11, %v600_v12  ;;  %v3488_v57 = vcombine.low %v597_v46, %v601_v47  ;;  %v649_v11 = vld [vmem:[%s5144_s3 + $0x968] sm:$0xff] }
  0x8a   :  { %2773 = vmatpush1.bf16.msra.mxu0 %v3430_v51  ;;  %2896 = vmatpush1.bf16.msra.mxu1 %v3432_v52  ;;  %v3489_v51 = vcombine.high %v597_v46, %v601_v47  ;;  %v604_v52 = vld [vmem:[%s5144_s3 + $0x800] sm:$0xff] }
  0x8b   :  { %2774 = vmatprep.subr.bf16.mxu0 %v3439_v53  ;;  %2897 = vmatprep.subr.bf16.mxu1 %v3441_v54  ;;  %v608_v53 = vld [vmem:[%s5144_s3 + $0x820] sm:$0xff]  ;;  %v605_v54 = vld [vmem:[%s5144_s3 + $0x808] sm:$0xff] }
  0x8c   :  { %v3495_v58 = vcombine.high %v604_v52, %v608_v53  ;;  %v3494_v17 = vcombine.low %v604_v52, %v608_v53  ;;  %v3496_v59 = vcombine.low %v605_v54, %v609_v55  ;;  %v657_v52 = vld [vmem:[%s5144_s3 + $0x9a8] sm:$0xff] }
  0x8e   :  { %2775 = vmatpush1.bf16.msra.mxu0 %v3438_v63  ;;  %2898 = vmatpush1.bf16.msra.mxu1 %v3440_v3  ;;  %v3497_v63 = vcombine.high %v605_v54, %v609_v55  ;;  %v612_v3 = vld [vmem:[%s5144_s3 + $0x840] sm:$0xff] }
  0x8f   :  { %2776 = vmatprep.subr.bf16.mxu0 %v3447_v4  ;;  %2899 = vmatprep.subr.bf16.mxu1 %v3449_v9  ;;  %v616_v4 = vld [vmem:[%s5144_s3 + $0x860] sm:$0xff]  ;;  %v613_v9 = vld [vmem:[%s5144_s3 + $0x848] sm:$0xff] }
  0x90   :  { %v3502_v20 = vcombine.low %v612_v3, %v616_v4  ;;  %v3504_v0 = vcombine.low %v613_v9, %v617_v15 }
  0x92   :  { %2777 = vmatpush1.bf16.msra.mxu0 %v3446_v18  ;;  %2900 = vmatpush1.bf16.msra.mxu1 %v3448_v62  ;;  %v3503_v18 = vcombine.high %v612_v3, %v616_v4  ;;  %v3505_v62 = vcombine.high %v613_v9, %v617_v15  ;;  %v665_v3 = vld [vmem:[%s5144_s3 + $0x9e8] sm:$0xff] }
  0x93   :  { %2778 = vmatprep.subr.bf16.mxu0 %v3455_v5  ;;  %2901 = vmatprep.subr.bf16.mxu1 %v3457_v6  ;;  %v620_v5 = vld [vmem:[%s5144_s3 + $0x880] sm:$0xff] }
  0x94   :  { %v624_v6 = vld [vmem:[%s5144_s3 + $0x8a0] sm:$0xff] }
  0x95   :  { %v3510_v61 = vcombine.low %v620_v5, %v624_v6 }
  0x96   :  { %2779 = vmatpush1.bf16.msra.mxu0 %v3454_v21  ;;  %2902 = vmatpush1.bf16.msra.mxu1 %v3456_v23  ;;  %v3511_v21 = vcombine.high %v620_v5, %v624_v6  ;;  %v3513_v23 = vcombine.high %v621_v30, %v625_v7  ;;  %v673_v5 = vld [vmem:[%s5144_s3 + $0xa28] sm:$0xff] }
  0x97   :  { %2780 = vmatprep.subr.bf16.mxu0 %v3463_v22  ;;  %2903 = vmatprep.subr.bf16.mxu1 %v3465_v24  ;;  %v628_v22 = vld [vmem:[%s5144_s3 + $0x8c0] sm:$0xff]  ;;  %v629_v24 = vld [vmem:[%s5144_s3 + $0x8c8] sm:$0xff] }
  0x98   :  { %v3519_v60 = vcombine.high %v628_v22, %v632_v8  ;;  %v3518_v33 = vcombine.low %v628_v22, %v632_v8  ;;  %v3520_v34 = vcombine.low %v629_v24, %v633_v25  ;;  %v681_v22 = vld [vmem:[%s5144_s3 + $0xa68] sm:$0xff] }
  0x9a   :  { %2781 = vmatpush1.bf16.msra.mxu0 %v3462_v1  ;;  %2904 = vmatpush1.bf16.msra.mxu1 %v3464_v27  ;;  %v3521_v1 = vcombine.high %v629_v24, %v633_v25  ;;  %v636_v27 = vld [vmem:[%s5144_s3 + $0x900] sm:$0xff] }
  0x9b   :  { %2782 = vmatprep.subr.bf16.mxu0 %v3471_v28  ;;  %2905 = vmatprep.subr.bf16.mxu1 %v3473_v29  ;;  %v640_v28 = vld [vmem:[%s5144_s3 + $0x920] sm:$0xff]  ;;  %v637_v29 = vld [vmem:[%s5144_s3 + $0x908] sm:$0xff] }
  0x9c   :  { %v3527_v36 = vcombine.high %v636_v27, %v640_v28  ;;  %v3526_v12 = vcombine.low %v636_v27, %v640_v28  ;;  %v3528_v46 = vcombine.low %v637_v29, %v641_v31  ;;  %v689_v27 = vld [vmem:[%s5144_s3 + $0xaa8] sm:$0xff] }
  0x9e   :  { %2783 = vmatpush1.bf16.msra.mxu0 %v3470_v37  ;;  %2906 = vmatpush1.bf16.msra.mxu1 %v3472_v39  ;;  %v3529_v37 = vcombine.high %v637_v29, %v641_v31  ;;  %v644_v39 = vld [vmem:[%s5144_s3 + $0x940] sm:$0xff] }
  0x9f   :  { %2784 = vmatprep.subr.bf16.mxu0 %v3479_v45  ;;  %2907 = vmatprep.subr.bf16.mxu1 %v3481_v2  ;;  %v648_v45 = vld [vmem:[%s5144_s3 + $0x960] sm:$0xff]  ;;  %v645_v2 = vld [vmem:[%s5144_s3 + $0x948] sm:$0xff] }
  0xa0   :  { %v3535_v47 = vcombine.high %v644_v39, %v648_v45  ;;  %v3534_v53 = vcombine.low %v644_v39, %v648_v45  ;;  %v3536_v54 = vcombine.low %v645_v2, %v649_v11  ;;  %v697_v39 = vld [vmem:[%s5144_s3 + $0xae8] sm:$0xff] }
  0xa2   :  { %2785 = vmatpush1.bf16.msra.mxu0 %v3478_v48  ;;  %2908 = vmatpush1.bf16.msra.mxu1 %v3480_v49  ;;  %v3537_v48 = vcombine.high %v645_v2, %v649_v11  ;;  %v652_v49 = vld [vmem:[%s5144_s3 + $0x980] sm:$0xff] }
  0xa3   :  { %2786 = vmatprep.subr.bf16.mxu0 %v3487_v50  ;;  %2909 = vmatprep.subr.bf16.mxu1 %v3489_v51  ;;  %v656_v50 = vld [vmem:[%s5144_s3 + $0x9a0] sm:$0xff]  ;;  %v653_v51 = vld [vmem:[%s5144_s3 + $0x988] sm:$0xff] }
  0xa4   :  { %v3543_v55 = vcombine.high %v652_v49, %v656_v50  ;;  %v3542_v4 = vcombine.low %v652_v49, %v656_v50  ;;  %v3544_v9 = vcombine.low %v653_v51, %v657_v52  ;;  %v705_v49 = vld [vmem:[%s5144_s3 + $0xb28] sm:$0xff] }
  0xa6   :  { %2787 = vmatpush1.bf16.msra.mxu0 %v3486_v56  ;;  %2910 = vmatpush1.bf16.msra.mxu1 %v3488_v57  ;;  %v3545_v56 = vcombine.high %v653_v51, %v657_v52  ;;  %v660_v57 = vld [vmem:[%s5144_s3 + $0x9c0] sm:$0xff] }
  0xa7   :  { %2797 = vmatprep.subr.bf16.mxu0 %v3495_v58  ;;  %2920 = vmatprep.subr.bf16.mxu1 %v3497_v63  ;;  %v664_v58 = vld [vmem:[%s5144_s3 + $0x9e0] sm:$0xff]  ;;  %v661_v63 = vld [vmem:[%s5144_s3 + $0x9c8] sm:$0xff] }
  0xa8   :  { %v3551_v15 = vcombine.high %v660_v57, %v664_v58  ;;  %v3550_v6 = vcombine.low %v660_v57, %v664_v58  ;;  %v3552_v30 = vcombine.low %v661_v63, %v665_v3  ;;  %v713_v57 = vld [vmem:[%s5144_s3 + $0xb68] sm:$0xff] }
  0xa9   :  { %2789 = vmatmul.mubr.bf16.vlgmr.msra.gmra.mrb[0].mxu0 %v4346_v16  ;;  %2912 = vmatmul.mubr.bf16.vlgmr.msra.gmra.mrb[0].mxu1 %v4346_v16 }
  0xaa   :  { %2798 = vmatpush1.bf16.msra.mxu0 %v3494_v17  ;;  %2921 = vmatpush1.bf16.msra.mxu1 %v3496_v59  ;;  %v3553_v17 = vcombine.high %v661_v63, %v665_v3  ;;  %v668_v59 = vld [vmem:[%s5144_s3 + $0xa00] sm:$0xff] }
  0xab   :  { %2799 = vmatprep.subr.bf16.mxu0 %v3503_v18  ;;  %2922 = vmatprep.subr.bf16.mxu1 %v3505_v62  ;;  %v672_v18 = vld [vmem:[%s5144_s3 + $0xa20] sm:$0xff]  ;;  %v669_v62 = vld [vmem:[%s5144_s3 + $0xa08] sm:$0xff] }
  0xac   :  { %2829 = vmatprep.mubr.bf16.mxu0 %v4362_v10  ;;  %2952 = vmatprep.mubr.bf16.mxu1 %v4362_v10  ;;  %v3559_v7 = vcombine.high %v668_v59, %v672_v18  ;;  %v3558_v8 = vcombine.low %v668_v59, %v672_v18  ;;  %v3560_v24 = vcombine.low %v669_v62, %v673_v5  ;;  %v721_v59 = vld [vmem:[%s5144_s3 + $0xba8] sm:$0xff] }
  0xae   :  { %2800 = vmatpush1.bf16.msra.mxu0 %v3502_v20  ;;  %2923 = vmatpush1.bf16.msra.mxu1 %v3504_v0  ;;  %v3561_v20 = vcombine.high %v669_v62, %v673_v5  ;;  %v676_v0 = vld [vmem:[%s5144_s3 + $0xa40] sm:$0xff] }
  0xaf   :  { %2801 = vmatprep.subr.bf16.mxu0 %v3511_v21  ;;  %2924 = vmatprep.subr.bf16.mxu1 %v3513_v23  ;;  %v680_v21 = vld [vmem:[%s5144_s3 + $0xa60] sm:$0xff]  ;;  %v677_v23 = vld [vmem:[%s5144_s3 + $0xa48] sm:$0xff] }
  0xb0   :  { %v3567_v25 = vcombine.high %v676_v0, %v680_v21  ;;  %v3566_v28 = vcombine.low %v676_v0, %v680_v21  ;;  %v3568_v29 = vcombine.low %v677_v23, %v681_v22  ;;  %v729_v0 = vld [vmem:[%s5144_s3 + $0xbe8] sm:$0xff] }
  0xb2   :  { %2802 = vmatpush1.bf16.msra.mxu0 %v3510_v61  ;;  %2925 = vmatpush1.bf16.msra.mxu1 %v3512_v26  ;;  %v3569_v61 = vcombine.high %v677_v23, %v681_v22  ;;  %v684_v26 = vld [vmem:[%s5144_s3 + $0xa80] sm:$0xff] }
  0xb3   :  { %2803 = vmatprep.subr.bf16.mxu0 %v3519_v60  ;;  %2926 = vmatprep.subr.bf16.mxu1 %v3521_v1  ;;  %v688_v60 = vld [vmem:[%s5144_s3 + $0xaa0] sm:$0xff]  ;;  %v685_v1 = vld [vmem:[%s5144_s3 + $0xa88] sm:$0xff] }
  0xb4   :  { %v3575_v31 = vcombine.high %v684_v26, %v688_v60  ;;  %v3574_v45 = vcombine.low %v684_v26, %v688_v60  ;;  %v3576_v2 = vcombine.low %v685_v1, %v689_v27  ;;  %v355_v26 = vld [vmem:[%s5144_s3 + $0x38] sm:$0xff] }
  0xb6   :  { %2804 = vmatpush1.bf16.msra.mxu0 %v3518_v33  ;;  %2927 = vmatpush1.bf16.msra.mxu1 %v3520_v34  ;;  %v3577_v33 = vcombine.high %v685_v1, %v689_v27  ;;  %v692_v34 = vld [vmem:[%s5144_s3 + $0xac0] sm:$0xff] }
  0xb7   :  { %2805 = vmatprep.subr.bf16.mxu0 %v3527_v36  ;;  %2928 = vmatprep.subr.bf16.mxu1 %v3529_v37  ;;  %v696_v36 = vld [vmem:[%s5144_s3 + $0xae0] sm:$0xff]  ;;  %v693_v37 = vld [vmem:[%s5144_s3 + $0xac8] sm:$0xff] }
  0xb8   :  { %v3583_v11 = vcombine.high %v692_v34, %v696_v36  ;;  %v3582_v50 = vcombine.low %v692_v34, %v696_v36  ;;  %v3584_v51 = vcombine.low %v693_v37, %v697_v39  ;;  %v363_v34 = vld [vmem:[%s5144_s3 + $0x78] sm:$0xff]  ;;  %v4550_v36 = vpack.c.bf16 %v4160_v14, %v4160_v14 }
  0xb9   :  { %v367_v14 = vld [vmem:[%s5144_s3 + $0x98] sm:$0xff] }
  0xba   :  { %2806 = vmatpush1.bf16.msra.mxu0 %v3526_v12  ;;  %2929 = vmatpush1.bf16.msra.mxu1 %v3528_v46  ;;  %v3585_v12 = vcombine.high %v693_v37, %v697_v39  ;;  %v700_v46 = vld [vmem:[%s5144_s3 + $0xb00] sm:$0xff] }
  0xbb   :  { %2807 = vmatprep.subr.bf16.mxu0 %v3535_v47  ;;  %2930 = vmatprep.subr.bf16.mxu1 %v3537_v48  ;;  %v704_v47 = vld [vmem:[%s5144_s3 + $0xb20] sm:$0xff]  ;;  %v701_v48 = vld [vmem:[%s5144_s3 + $0xb08] sm:$0xff] }
  0xbc   :  { %v3591_v52 = vcombine.high %v700_v46, %v704_v47  ;;  %v3590_v58 = vcombine.low %v700_v46, %v704_v47  ;;  %v3592_v63 = vcombine.low %v701_v48, %v705_v49  ;;  %v371_v46 = vld [vmem:[%s5144_s3 + $0xb8] sm:$0xff] }
  0xbe   :  { %2808 = vmatpush1.bf16.msra.mxu0 %v3534_v53  ;;  %2931 = vmatpush1.bf16.msra.mxu1 %v3536_v54  ;;  %v3593_v53 = vcombine.high %v701_v48, %v705_v49  ;;  %v708_v54 = vld [vmem:[%s5144_s3 + $0xb40] sm:$0xff] }
  0xbf   :  { %2809 = vmatprep.subr.bf16.mxu0 %v3543_v55  ;;  %2932 = vmatprep.subr.bf16.mxu1 %v3545_v56  ;;  %v712_v55 = vld [vmem:[%s5144_s3 + $0xb60] sm:$0xff]  ;;  %v709_v56 = vld [vmem:[%s5144_s3 + $0xb48] sm:$0xff] }
  0xc0   :  { %v3599_v3 = vcombine.high %v708_v54, %v712_v55  ;;  %v3598_v18 = vcombine.low %v708_v54, %v712_v55  ;;  %v3600_v62 = vcombine.low %v709_v56, %v713_v57  ;;  %v379_v54 = vld [vmem:[%s5144_s3 + $0xf8] sm:$0xff] }
  0xc2   :  { %2810 = vmatpush1.bf16.msra.mxu0 %v3542_v4  ;;  %2933 = vmatpush1.bf16.msra.mxu1 %v3544_v9  ;;  %v3601_v4 = vcombine.high %v709_v56, %v713_v57  ;;  %v716_v9 = vld [vmem:[%s5144_s3 + $0xb80] sm:$0xff]  ;;  %v3260_v56 = vcombine.low %v367_v14, %v371_v46 }
  0xc3   :  { %2811 = vmatprep.subr.bf16.mxu0 %v3551_v15  ;;  %2934 = vmatprep.subr.bf16.mxu1 %v3553_v17  ;;  %v720_v15 = vld [vmem:[%s5144_s3 + $0xba0] sm:$0xff]  ;;  %v717_v17 = vld [vmem:[%s5144_s3 + $0xb88] sm:$0xff] }
  0xc4   :  { %v3607_v5 = vcombine.high %v716_v9, %v720_v15  ;;  %v3606_v21 = vcombine.low %v716_v9, %v720_v15  ;;  %v3608_v23 = vcombine.low %v717_v17, %v721_v59 }
  0xc6   :  { %2812 = vmatpush1.bf16.msra.mxu0 %v3550_v6  ;;  %2935 = vmatpush1.bf16.msra.mxu1 %v3552_v30  ;;  %v3609_v6 = vcombine.high %v717_v17, %v721_v59  ;;  %v724_v30 = vld [vmem:[%s5144_s3 + $0xbc0] sm:$0xff] }
  0xc7   :  { %2813 = vmatprep.subr.bf16.mxu0 %v3559_v7  ;;  %2936 = vmatprep.subr.bf16.mxu1 %v3561_v20  ;;  %v728_v7 = vld [vmem:[%s5144_s3 + $0xbe0] sm:$0xff]  ;;  %v725_v20 = vld [vmem:[%s5144_s3 + $0xbc8] sm:$0xff] }
  0xc8   :  { %v3615_v22 = vcombine.high %v724_v30, %v728_v7  ;;  %v3614_v60 = vcombine.low %v724_v30, %v728_v7  ;;  %v3616_v1 = vcombine.low %v725_v20, %v729_v0 }
  0xca   :  { %2814 = vmatpush1.bf16.msra.mxu0 %v3558_v8  ;;  %2937 = vmatpush1.bf16.msra.mxu1 %v3560_v24  ;;  %v3617_v8 = vcombine.high %v725_v20, %v729_v0  ;;  %v350_v24 = vld [vmem:[%s5144_s3 + $0x10] sm:$0xff] }
  0xcb   :  { %2815 = vmatprep.subr.bf16.mxu0 %v3567_v25  ;;  %2938 = vmatprep.subr.bf16.mxu1 %v3569_v61  ;;  %v354_v25 = vld [vmem:[%s5144_s3 + $0x30] sm:$0xff]  ;;  %v351_v61 = vld [vmem:[%s5144_s3 + $0x18] sm:$0xff] }
  0xcc   :  { %v3243_v27 = vcombine.high %v350_v24, %v354_v25  ;;  %v3242_v37 = vcombine.low %v350_v24, %v354_v25  ;;  %v3244_v39 = vcombine.low %v351_v61, %v355_v26 }
  0xce   :  { %2816 = vmatpush1.bf16.msra.mxu0 %v3566_v28  ;;  %2939 = vmatpush1.bf16.msra.mxu1 %v3568_v29  ;;  %v3245_v28 = vcombine.high %v351_v61, %v355_v26  ;;  %v358_v29 = vld [vmem:[%s5144_s3 + $0x50] sm:$0xff] }
  0xcf   :  { %2817 = vmatprep.subr.bf16.mxu0 %v3575_v31  ;;  %2940 = vmatprep.subr.bf16.mxu1 %v3577_v33  ;;  %v362_v31 = vld [vmem:[%s5144_s3 + $0x70] sm:$0xff]  ;;  %v359_v33 = vld [vmem:[%s5144_s3 + $0x58] sm:$0xff] }
  0xd0   :  { %v3250_v47 = vcombine.low %v358_v29, %v362_v31  ;;  %v3252_v48 = vcombine.low %v359_v33, %v363_v34 }
  0xd2   :  { %2818 = vmatpush1.bf16.msra.mxu0 %v3574_v45  ;;  %2941 = vmatpush1.bf16.msra.mxu1 %v3576_v2  ;;  %v3251_v45 = vcombine.high %v358_v29, %v362_v31  ;;  %v3253_v2 = vcombine.high %v359_v33, %v363_v34 }
  0xd3   :  { %2819 = vmatprep.subr.bf16.mxu0 %v3583_v11  ;;  %2942 = vmatprep.subr.bf16.mxu1 %v3585_v12  ;;  %v366_v11 = vld [vmem:[%s5144_s3 + $0x90] sm:$0xff] }
  0xd4   :  { %v370_v12 = vld [vmem:[%s5144_s3 + $0xb0] sm:$0xff] }
  0xd5   :  { %v3259_v49 = vcombine.high %v366_v11, %v370_v12  ;;  %v3258_v55 = vcombine.low %v366_v11, %v370_v12 }
  0xd6   :  { %2820 = vmatpush1.bf16.msra.mxu0 %v3582_v50  ;;  %2943 = vmatpush1.bf16.msra.mxu1 %v3584_v51  ;;  %v3261_v50 = vcombine.high %v367_v14, %v371_v46  ;;  %v374_v51 = vld [vmem:[%s5144_s3 + $0xd0] sm:$0xff] }
  0xd7   :  { %2821 = vmatprep.subr.bf16.mxu0 %v3591_v52  ;;  %2944 = vmatprep.subr.bf16.mxu1 %v3593_v53  ;;  %v378_v52 = vld [vmem:[%s5144_s3 + $0xf0] sm:$0xff]  ;;  %v375_v53 = vld [vmem:[%s5144_s3 + $0xd8] sm:$0xff] }
  0xd8   :  { %v3267_v57 = vcombine.high %v374_v51, %v378_v52  ;;  %v3266_v9 = vcombine.low %v374_v51, %v378_v52  ;;  %v3268_v15 = vcombine.low %v375_v53, %v379_v54 }
  0xda   :  { %2822 = vmatpush1.bf16.msra.mxu0 %v3590_v58  ;;  %2945 = vmatpush1.bf16.msra.mxu1 %v3592_v63  ;;  %v3269_v58 = vcombine.high %v375_v53, %v379_v54  ;;  %v382_v63 = vld [vmem:[%s5144_s3 + $0x110] sm:$0xff] }
  0xdb   :  { %2823 = vmatprep.subr.bf16.mxu0 %v3599_v3  ;;  %2946 = vmatprep.subr.bf16.mxu1 %v3601_v4  ;;  %v386_v3 = vld [vmem:[%s5144_s3 + $0x130] sm:$0xff]  ;;  %v387_v4 = vld [vmem:[%s5144_s3 + $0x138] sm:$0xff] }
  0xdc   :  { %v3275_v17 = vcombine.high %v382_v63, %v386_v3  ;;  %v3274_v30 = vcombine.low %v382_v63, %v386_v3 }
  0xde   :  { %2824 = vmatpush1.bf16.msra.mxu0 %v3598_v18  ;;  %2947 = vmatpush1.bf16.msra.mxu1 %v3600_v62  ;;  %v390_v18 = vld [vmem:[%s5144_s3 + $0x150] sm:$0xff] }
  0xdf   :  { %2825 = vmatprep.subr.bf16.mxu0 %v3607_v5  ;;  %2948 = vmatprep.subr.bf16.mxu1 %v3609_v6  ;;  %v394_v62 = vld [vmem:[%s5144_s3 + $0x170] sm:$0xff]  ;;  %v391_v5 = vld [vmem:[%s5144_s3 + $0x158] sm:$0xff] }
  0xe0   :  { %v395_v6 = vld [vmem:[%s5144_s3 + $0x178] sm:$0xff]  ;;  %v3283_v20 = vcombine.high %v390_v18, %v394_v62  ;;  %v3282_v24 = vcombine.low %v390_v18, %v394_v62 }
  0xe1   :  { %v3285_v0 = vcombine.high %v391_v5, %v395_v6  ;;  %v3284_v25 = vcombine.low %v391_v5, %v395_v6 }
  0xe2   :  { %2826 = vmatpush1.bf16.msra.mxu0 %v3606_v21  ;;  %2949 = vmatpush1.bf16.msra.mxu1 %v3608_v23  ;;  %v398_v21 = vld [vmem:[%s5144_s3 + $0x190] sm:$0xff] }
  0xe3   :  { %2827 = vmatprep.subr.bf16.mxu0 %v3615_v22  ;;  %2950 = vmatprep.subr.bf16.mxu1 %v3617_v8  ;;  %v402_v23 = vld [vmem:[%s5144_s3 + $0x1b0] sm:$0xff]  ;;  %v399_v22 = vld [vmem:[%s5144_s3 + $0x198] sm:$0xff] }
  0xe4   :  { %v403_v8 = vld [vmem:[%s5144_s3 + $0x1b8] sm:$0xff]  ;;  %v3291_v61 = vcombine.high %v398_v21, %v402_v23  ;;  %v3290_v29 = vcombine.low %v398_v21, %v402_v23 }
  0xe5   :  { %v3293_v26 = vcombine.high %v399_v22, %v403_v8  ;;  %v3292_v31 = vcombine.low %v399_v22, %v403_v8 }
  0xe6   :  { %2828 = vmatpush1.bf16.msra.mxu0 %v3614_v60  ;;  %2951 = vmatpush1.bf16.msra.mxu1 %v3616_v1  ;;  %v406_v60 = vld [vmem:[%s5144_s3 + $0x1d0] sm:$0xff] }
  0xe7   :  { %2961 = vmatprep.subr.bf16.mxu0 %v3243_v27  ;;  %3084 = vmatprep.subr.bf16.mxu1 %v3245_v28  ;;  %v410_v1 = vld [vmem:[%s5144_s3 + $0x1f0] sm:$0xff]  ;;  %v407_v27 = vld [vmem:[%s5144_s3 + $0x1d8] sm:$0xff] }
  0xe8   :  { %v411_v28 = vld [vmem:[%s5144_s3 + $0x1f8] sm:$0xff]  ;;  %v3299_v33 = vcombine.high %v406_v60, %v410_v1  ;;  %v3298_v11 = vcombine.low %v406_v60, %v410_v1 }
  0xe9   :  { %2830 = vmatmul.mubr.bf16.vlgmr.msra.gmra.mrb[0].mxu0 %v4550_v36  ;;  %2953 = vmatmul.mubr.bf16.vlgmr.msra.gmra.mrb[0].mxu1 %v4550_v36  ;;  %v3301_v34 = vcombine.high %v407_v27, %v411_v28  ;;  %v3300_v12 = vcombine.low %v407_v27, %v411_v28 }
  0xea   :  { %2962 = vmatpush1.bf16.msra.mxu0 %v3242_v37  ;;  %3085 = vmatpush1.bf16.msra.mxu1 %v3244_v39  ;;  %v414_v37 = vld [vmem:[%s5144_s3 + $0x210] sm:$0xff] }
  0xeb   :  { %2963 = vmatprep.subr.bf16.mxu0 %v3251_v45  ;;  %3086 = vmatprep.subr.bf16.mxu1 %v3253_v2  ;;  %v418_v39 = vld [vmem:[%s5144_s3 + $0x230] sm:$0xff]  ;;  %v415_v45 = vld [vmem:[%s5144_s3 + $0x218] sm:$0xff] }
  0xec   :  { %2993 = vmatprep.mubr.bf16.mxu0 %v4133_v32  ;;  %3116 = vmatprep.mubr.bf16.mxu1 %v4133_v32  ;;  %v383_v32 = vld [vmem:[%s5144_s3 + $0x118] sm:$0xff]  ;;  %v3307_v14 = vcombine.high %v414_v37, %v418_v39  ;;  %v3306_v51 = vcombine.low %v414_v37, %v418_v39 }
  0xed   :  { %v3277_v59 = vcombine.high %v383_v32, %v387_v4  ;;  %v3276_v7 = vcombine.low %v383_v32, %v387_v4  ;;  %v419_v2 = vld [vmem:[%s5144_s3 + $0x238] sm:$0xff] }
  0xee   :  { %2964 = vmatpush1.bf16.msra.mxu0 %v3250_v47  ;;  %3087 = vmatpush1.bf16.msra.mxu1 %v3252_v48  ;;  %v3309_v46 = vcombine.high %v415_v45, %v419_v2  ;;  %v422_v47 = vld [vmem:[%s5144_s3 + $0x250] sm:$0xff]  ;;  %v3308_v52 = vcombine.low %v415_v45, %v419_v2 }
  0xef   :  { %2965 = vmatprep.subr.bf16.mxu0 %v3259_v49  ;;  %3088 = vmatprep.subr.bf16.mxu1 %v3261_v50  ;;  %v426_v48 = vld [vmem:[%s5144_s3 + $0x270] sm:$0xff]  ;;  %v423_v49 = vld [vmem:[%s5144_s3 + $0x258] sm:$0xff] }
  0xf0   :  { %v427_v50 = vld [vmem:[%s5144_s3 + $0x278] sm:$0xff]  ;;  %v3315_v53 = vcombine.high %v422_v47, %v426_v48  ;;  %v3314_v63 = vcombine.low %v422_v47, %v426_v48 }
  0xf1   :  { %v3317_v54 = vcombine.high %v423_v49, %v427_v50  ;;  %v3316_v3 = vcombine.low %v423_v49, %v427_v50 }
  0xf2   :  { %2966 = vmatpush1.bf16.msra.mxu0 %v3258_v55  ;;  %3089 = vmatpush1.bf16.msra.mxu1 %v3260_v56  ;;  %v430_v55 = vld [vmem:[%s5144_s3 + $0x290] sm:$0xff] }
  0xf3   :  { %2967 = vmatprep.subr.bf16.mxu0 %v3267_v57  ;;  %3090 = vmatprep.subr.bf16.mxu1 %v3269_v58  ;;  %v434_v56 = vld [vmem:[%s5144_s3 + $0x2b0] sm:$0xff]  ;;  %v431_v57 = vld [vmem:[%s5144_s3 + $0x298] sm:$0xff] }
  0xf4   :  { %v435_v58 = vld [vmem:[%s5144_s3 + $0x2b8] sm:$0xff]  ;;  %v3323_v32 = vcombine.high %v430_v55, %v434_v56  ;;  %v3322_v18 = vcombine.low %v430_v55, %v434_v56 }
  0xf5   :  { %v3325_v4 = vcombine.high %v431_v57, %v435_v58  ;;  %v3324_v62 = vcombine.low %v431_v57, %v435_v58 }
  0xf6   :  { %2968 = vmatpush1.bf16.msra.mxu0 %v3266_v9  ;;  %3091 = vmatpush1.bf16.msra.mxu1 %v3268_v15  ;;  %v438_v9 = vld [vmem:[%s5144_s3 + $0x2d0] sm:$0xff] }
  0xf7   :  { %2969 = vmatprep.subr.bf16.mxu0 %v3275_v17  ;;  %3092 = vmatprep.subr.bf16.mxu1 %v3277_v59  ;;  %v442_v15 = vld [vmem:[%s5144_s3 + $0x2f0] sm:$0xff]  ;;  %v439_v17 = vld [vmem:[%s5144_s3 + $0x2d8] sm:$0xff] }
  0xf8   :  { %v443_v59 = vld [vmem:[%s5144_s3 + $0x2f8] sm:$0xff]  ;;  %v3331_v5 = vcombine.high %v438_v9, %v442_v15  ;;  %v3330_v21 = vcombine.low %v438_v9, %v442_v15 }
  0xf9   :  { %v3333_v6 = vcombine.high %v439_v17, %v443_v59  ;;  %v3332_v23 = vcombine.low %v439_v17, %v443_v59 }
  0xfa   :  { %2970 = vmatpush1.bf16.msra.mxu0 %v3274_v30  ;;  %3093 = vmatpush1.bf16.msra.mxu1 %v3276_v7  ;;  %v446_v30 = vld [vmem:[%s5144_s3 + $0x310] sm:$0xff] }
  0xfb   :  { %2971 = vmatprep.subr.bf16.mxu0 %v3283_v20  ;;  %3094 = vmatprep.subr.bf16.mxu1 %v3285_v0  ;;  %v450_v7 = vld [vmem:[%s5144_s3 + $0x330] sm:$0xff]  ;;  %v447_v20 = vld [vmem:[%s5144_s3 + $0x318] sm:$0xff] }
  0xfc   :  { %v451_v0 = vld [vmem:[%s5144_s3 + $0x338] sm:$0xff]  ;;  %v3339_v22 = vcombine.high %v446_v30, %v450_v7  ;;  %v3338_v60 = vcombine.low %v446_v30, %v450_v7 }
  0xfd   :  { %v3341_v8 = vcombine.high %v447_v20, %v451_v0  ;;  %v3340_v1 = vcombine.low %v447_v20, %v451_v0 }
  0xfe   :  { %2972 = vmatpush1.bf16.msra.mxu0 %v3282_v24  ;;  %3095 = vmatpush1.bf16.msra.mxu1 %v3284_v25  ;;  %v454_v24 = vld [vmem:[%s5144_s3 + $0x350] sm:$0xff] }
  0xff   :  { %2973 = vmatprep.subr.bf16.mxu0 %v3291_v61  ;;  %3096 = vmatprep.subr.bf16.mxu1 %v3293_v26  ;;  %v458_v25 = vld [vmem:[%s5144_s3 + $0x370] sm:$0xff]  ;;  %v455_v61 = vld [vmem:[%s5144_s3 + $0x358] sm:$0xff] }
 0x100   :  { %v459_v26 = vld [vmem:[%s5144_s3 + $0x378] sm:$0xff]  ;;  %v3347_v27 = vcombine.high %v454_v24, %v458_v25  ;;  %v3346_v37 = vcombine.low %v454_v24, %v458_v25 }
 0x101   :  { %v3349_v28 = vcombine.high %v455_v61, %v459_v26  ;;  %v3348_v39 = vcombine.low %v455_v61, %v459_v26  ;;  %v510_v26 = vld [vmem:[%s5144_s3 + $0x510] sm:$0xff] }
 0x102   :  { %2974 = vmatpush1.bf16.msra.mxu0 %v3290_v29  ;;  %3097 = vmatpush1.bf16.msra.mxu1 %v3292_v31  ;;  %v462_v29 = vld [vmem:[%s5144_s3 + $0x390] sm:$0xff] }
 0x103   :  { %2975 = vmatprep.subr.bf16.mxu0 %v3299_v33  ;;  %3098 = vmatprep.subr.bf16.mxu1 %v3301_v34  ;;  %v466_v31 = vld [vmem:[%s5144_s3 + $0x3b0] sm:$0xff]  ;;  %v463_v33 = vld [vmem:[%s5144_s3 + $0x398] sm:$0xff] }
 0x104   :  { %v467_v34 = vld [vmem:[%s5144_s3 + $0x3b8] sm:$0xff]  ;;  %v3355_v45 = vcombine.high %v462_v29, %v466_v31  ;;  %v3354_v47 = vcombine.low %v462_v29, %v466_v31 }
 0x105   :  { %v3357_v2 = vcombine.high %v463_v33, %v467_v34  ;;  %v3356_v48 = vcombine.low %v463_v33, %v467_v34  ;;  %v518_v33 = vld [vmem:[%s5144_s3 + $0x550] sm:$0xff] }
 0x106   :  { %2976 = vmatpush1.bf16.msra.mxu0 %v3298_v11  ;;  %3099 = vmatpush1.bf16.msra.mxu1 %v3300_v12  ;;  %v470_v11 = vld [vmem:[%s5144_s3 + $0x3d0] sm:$0xff] }
 0x107   :  { %2977 = vmatprep.subr.bf16.mxu0 %v3307_v14  ;;  %3100 = vmatprep.subr.bf16.mxu1 %v3309_v46  ;;  %v474_v12 = vld [vmem:[%s5144_s3 + $0x3f0] sm:$0xff]  ;;  %v471_v14 = vld [vmem:[%s5144_s3 + $0x3d8] sm:$0xff] }
 0x108   :  { %v475_v46 = vld [vmem:[%s5144_s3 + $0x3f8] sm:$0xff]  ;;  %v3363_v49 = vcombine.high %v470_v11, %v474_v12  ;;  %v3362_v55 = vcombine.low %v470_v11, %v474_v12  ;;  %v522_v34 = vld [vmem:[%s5144_s3 + $0x570] sm:$0xff] }
 0x109   :  { %v3365_v50 = vcombine.high %v471_v14, %v475_v46  ;;  %v3364_v56 = vcombine.low %v471_v14, %v475_v46  ;;  %v3411_v11 = vcombine.high %v518_v33, %v522_v34  ;;  %v526_v14 = vld [vmem:[%s5144_s3 + $0x590] sm:$0xff] }
 0x10a   :  { %2978 = vmatpush1.bf16.msra.mxu0 %v3306_v51  ;;  %3101 = vmatpush1.bf16.msra.mxu1 %v3308_v52  ;;  %v478_v51 = vld [vmem:[%s5144_s3 + $0x410] sm:$0xff] }
 0x10b   :  { %2979 = vmatprep.subr.bf16.mxu0 %v3315_v53  ;;  %3102 = vmatprep.subr.bf16.mxu1 %v3317_v54  ;;  %v482_v52 = vld [vmem:[%s5144_s3 + $0x430] sm:$0xff]  ;;  %v479_v53 = vld [vmem:[%s5144_s3 + $0x418] sm:$0xff] }
 0x10c   :  { %v483_v54 = vld [vmem:[%s5144_s3 + $0x438] sm:$0xff]  ;;  %v3371_v57 = vcombine.high %v478_v51, %v482_v52  ;;  %v3370_v9 = vcombine.low %v478_v51, %v482_v52  ;;  %v530_v46 = vld [vmem:[%s5144_s3 + $0x5b0] sm:$0xff] }
 0x10d   :  { %v3373_v58 = vcombine.high %v479_v53, %v483_v54  ;;  %v3372_v15 = vcombine.low %v479_v53, %v483_v54  ;;  %v3419_v51 = vcombine.high %v526_v14, %v530_v46  ;;  %v534_v53 = vld [vmem:[%s5144_s3 + $0x5d0] sm:$0xff] }
 0x10e   :  { %2980 = vmatpush1.bf16.msra.mxu0 %v3314_v63  ;;  %3103 = vmatpush1.bf16.msra.mxu1 %v3316_v3  ;;  %v486_v63 = vld [vmem:[%s5144_s3 + $0x450] sm:$0xff] }
 0x10f   :  { %2981 = vmatprep.subr.bf16.mxu0 %v3323_v32  ;;  %3104 = vmatprep.subr.bf16.mxu1 %v3325_v4  ;;  %v490_v3 = vld [vmem:[%s5144_s3 + $0x470] sm:$0xff]  ;;  %v487_v32 = vld [vmem:[%s5144_s3 + $0x458] sm:$0xff] }
 0x110   :  { %v491_v4 = vld [vmem:[%s5144_s3 + $0x478] sm:$0xff]  ;;  %v3379_v17 = vcombine.high %v486_v63, %v490_v3  ;;  %v3378_v30 = vcombine.low %v486_v63, %v490_v3  ;;  %v538_v54 = vld [vmem:[%s5144_s3 + $0x5f0] sm:$0xff] }
 0x111   :  { %v3381_v59 = vcombine.high %v487_v32, %v491_v4  ;;  %v3380_v7 = vcombine.low %v487_v32, %v491_v4  ;;  %v3427_v63 = vcombine.high %v534_v53, %v538_v54  ;;  %v542_v32 = vld [vmem:[%s5144_s3 + $0x610] sm:$0xff] }
 0x112   :  { %2982 = vmatpush1.bf16.msra.mxu0 %v3322_v18  ;;  %3105 = vmatpush1.bf16.msra.mxu1 %v3324_v62  ;;  %v494_v18 = vld [vmem:[%s5144_s3 + $0x490] sm:$0xff] }
 0x113   :  { %2983 = vmatprep.subr.bf16.mxu0 %v3331_v5  ;;  %3106 = vmatprep.subr.bf16.mxu1 %v3333_v6  ;;  %v498_v62 = vld [vmem:[%s5144_s3 + $0x4b0] sm:$0xff]  ;;  %v495_v5 = vld [vmem:[%s5144_s3 + $0x498] sm:$0xff] }
 0x114   :  { %v499_v6 = vld [vmem:[%s5144_s3 + $0x4b8] sm:$0xff]  ;;  %v3387_v20 = vcombine.high %v494_v18, %v498_v62  ;;  %v546_v4 = vld [vmem:[%s5144_s3 + $0x630] sm:$0xff] }
 0x115   :  { %v3389_v0 = vcombine.high %v495_v5, %v499_v6  ;;  %v3388_v24 = vcombine.low %v495_v5, %v499_v6  ;;  %v550_v5 = vld [vmem:[%s5144_s3 + $0x650] sm:$0xff] }
 0x116   :  { %2984 = vmatpush1.bf16.msra.mxu0 %v3330_v21  ;;  %3107 = vmatpush1.bf16.msra.mxu1 %v3332_v23  ;;  %v502_v21 = vld [vmem:[%s5144_s3 + $0x4d0] sm:$0xff] }
 0x117   :  { %2985 = vmatprep.subr.bf16.mxu0 %v3339_v22  ;;  %3108 = vmatprep.subr.bf16.mxu1 %v3341_v8  ;;  %v506_v23 = vld [vmem:[%s5144_s3 + $0x4f0] sm:$0xff]  ;;  %v507_v22 = vld [vmem:[%s5144_s3 + $0x4f8] sm:$0xff]  ;;  %v3386_v8 = vcombine.low %v494_v18, %v498_v62  ;;  %v3435_v18 = vcombine.high %v542_v32, %v546_v4 }
 0x118   :  { %v3395_v25 = vcombine.high %v502_v21, %v506_v23  ;;  %v554_v6 = vld [vmem:[%s5144_s3 + $0x670] sm:$0xff] }
 0x11a   :  { %2986 = vmatpush1.bf16.msra.mxu0 %v3338_v60  ;;  %3109 = vmatpush1.bf16.msra.mxu1 %v3340_v1  ;;  %v514_v60 = vld [vmem:[%s5144_s3 + $0x530] sm:$0xff]  ;;  %v515_v1 = vld [vmem:[%s5144_s3 + $0x538] sm:$0xff] }
 0x11b   :  { %2987 = vmatprep.subr.bf16.mxu0 %v3347_v27  ;;  %3110 = vmatprep.subr.bf16.mxu1 %v3349_v28  ;;  %v3394_v27 = vcombine.low %v502_v21, %v506_v23  ;;  %v3403_v29 = vcombine.high %v510_v26, %v514_v60  ;;  %v3443_v21 = vcombine.high %v550_v5, %v554_v6 }
 0x11e   :  { %2988 = vmatpush1.bf16.msra.mxu0 %v3346_v37  ;;  %3111 = vmatpush1.bf16.msra.mxu1 %v3348_v39  ;;  %v519_v37 = vld [vmem:[%s5144_s3 + $0x558] sm:$0xff] }
 0x11f   :  { %2989 = vmatprep.subr.bf16.mxu0 %v3355_v45  ;;  %3112 = vmatprep.subr.bf16.mxu1 %v3357_v2  ;;  %v523_v39 = vld [vmem:[%s5144_s3 + $0x578] sm:$0xff]  ;;  %v3402_v45 = vcombine.low %v510_v26, %v514_v60 }
 0x120   :  { %v3413_v12 = vcombine.high %v519_v37, %v523_v39 }
 0x122   :  { %2990 = vmatpush1.bf16.msra.mxu0 %v3354_v47  ;;  %3113 = vmatpush1.bf16.msra.mxu1 %v3356_v48  ;;  %v527_v47 = vld [vmem:[%s5144_s3 + $0x598] sm:$0xff] }
 0x123   :  { %2991 = vmatprep.subr.bf16.mxu0 %v3363_v49  ;;  %3114 = vmatprep.subr.bf16.mxu1 %v3365_v50  ;;  %v531_v48 = vld [vmem:[%s5144_s3 + $0x5b8] sm:$0xff]  ;;  %v3410_v49 = vcombine.low %v518_v33, %v522_v34  ;;  %v3412_v50 = vcombine.low %v519_v37, %v523_v39  ;;  %v574_v37 = vld [vmem:[%s5144_s3 + $0x710] sm:$0xff] }
 0x124   :  { %v3421_v52 = vcombine.high %v527_v47, %v531_v48  ;;  %v578_v39 = vld [vmem:[%s5144_s3 + $0x730] sm:$0xff] }
 0x126   :  { %2992 = vmatpush1.bf16.msra.mxu0 %v3362_v55  ;;  %3115 = vmatpush1.bf16.msra.mxu1 %v3364_v56  ;;  %v535_v55 = vld [vmem:[%s5144_s3 + $0x5d8] sm:$0xff] }
 0x127   :  { %3002 = vmatprep.subr.bf16.mxu0 %v3371_v57  ;;  %3125 = vmatprep.subr.bf16.mxu1 %v3373_v58  ;;  %v539_v56 = vld [vmem:[%s5144_s3 + $0x5f8] sm:$0xff]  ;;  %v3418_v57 = vcombine.low %v526_v14, %v530_v46  ;;  %v3420_v58 = vcombine.low %v527_v47, %v531_v48  ;;  %v3467_v14 = vcombine.high %v574_v37, %v578_v39  ;;  %v582_v47 = vld [vmem:[%s5144_s3 + $0x750] sm:$0xff] }
 0x128   :  { %v3429_v3 = vcombine.high %v535_v55, %v539_v56  ;;  %v586_v48 = vld [vmem:[%s5144_s3 + $0x770] sm:$0xff] }
 0x129   :  { %2994 = vmatmul.mubr.bf16.vlgmr.msra.gmra.mrb[4].mxu0 %v4139_v35  ;;  %3117 = vmatmul.mubr.bf16.vlgmr.msra.gmra.mrb[4].mxu1 %v4139_v35  ;;  %v503_v35 = vld [vmem:[%s5144_s3 + $0x4d8] sm:$0xff] }
 0x12a   :  { %3003 = vmatpush1.bf16.msra.mxu0 %v3370_v9  ;;  %3126 = vmatpush1.bf16.msra.mxu1 %v3372_v15  ;;  %v3397_v61 = vcombine.high %v503_v35, %v507_v22  ;;  %v3396_v28 = vcombine.low %v503_v35, %v507_v22  ;;  %v543_v9 = vld [vmem:[%s5144_s3 + $0x618] sm:$0xff]  ;;  %v558_v35 = vld [vmem:[%s5144_s3 + $0x690] sm:$0xff] }
 0x12b   :  { %3004 = vmatprep.subr.bf16.mxu0 %v3379_v17  ;;  %3127 = vmatprep.subr.bf16.mxu1 %v3381_v59  ;;  %v547_v15 = vld [vmem:[%s5144_s3 + $0x638] sm:$0xff]  ;;  %v3426_v17 = vcombine.low %v534_v53, %v538_v54  ;;  %v3428_v59 = vcombine.low %v535_v55, %v539_v56  ;;  %v562_v22 = vld [vmem:[%s5144_s3 + $0x6b0] sm:$0xff]  ;;  %v3475_v53 = vcombine.high %v582_v47, %v586_v48 }
 0x12c   :  { %3034 = vmatprep.mubr.bf16.mxu0 %v4156_v13  ;;  %3157 = vmatprep.mubr.bf16.mxu1 %v4156_v13  ;;  %v511_v13 = vld [vmem:[%s5144_s3 + $0x518] sm:$0xff]  ;;  %v3437_v62 = vcombine.high %v543_v9, %v547_v15  ;;  %v3451_v26 = vcombine.high %v558_v35, %v562_v22  ;;  %v590_v55 = vld [vmem:[%s5144_s3 + $0x790] sm:$0xff] }
 0x12d   :  { %v3405_v31 = vcombine.high %v511_v13, %v515_v1  ;;  %v3404_v2 = vcombine.low %v511_v13, %v515_v1  ;;  %v566_v13 = vld [vmem:[%s5144_s3 + $0x6d0] sm:$0xff] }
 0x12e   :  { %3005 = vmatpush1.bf16.msra.mxu0 %v3378_v30  ;;  %3128 = vmatpush1.bf16.msra.mxu1 %v3380_v7  ;;  %v551_v30 = vld [vmem:[%s5144_s3 + $0x658] sm:$0xff]  ;;  %v570_v1 = vld [vmem:[%s5144_s3 + $0x6f0] sm:$0xff] }
 0x12f   :  { %3006 = vmatprep.subr.bf16.mxu0 %v3387_v20  ;;  %3129 = vmatprep.subr.bf16.mxu1 %v3389_v0  ;;  %v555_v7 = vld [vmem:[%s5144_s3 + $0x678] sm:$0xff]  ;;  %v3434_v20 = vcombine.low %v542_v32, %v546_v4  ;;  %v3436_v0 = vcombine.low %v543_v9, %v547_v15  ;;  %v3459_v33 = vcombine.high %v566_v13, %v570_v1  ;;  %v594_v56 = vld [vmem:[%s5144_s3 + $0x7b0] sm:$0xff] }
 0x130   :  { %v3445_v23 = vcombine.high %v551_v30, %v555_v7  ;;  %v3483_v32 = vcombine.high %v590_v55, %v594_v56  ;;  %v598_v9 = vld [vmem:[%s5144_s3 + $0x7d0] sm:$0xff] }
 0x131   :  { %v602_v15 = vld [vmem:[%s5144_s3 + $0x7f0] sm:$0xff] }
 0x132   :  { %3007 = vmatpush1.bf16.msra.mxu0 %v3386_v8  ;;  %3130 = vmatpush1.bf16.msra.mxu1 %v3388_v24  ;;  %v559_v8 = vld [vmem:[%s5144_s3 + $0x698] sm:$0xff] }
 0x133   :  { %3008 = vmatprep.subr.bf16.mxu0 %v3395_v25  ;;  %3131 = vmatprep.subr.bf16.mxu1 %v3397_v61  ;;  %v563_v24 = vld [vmem:[%s5144_s3 + $0x6b8] sm:$0xff]  ;;  %v3442_v25 = vcombine.low %v550_v5, %v554_v6  ;;  %v3444_v61 = vcombine.low %v551_v30, %v555_v7  ;;  %v3491_v5 = vcombine.high %v598_v9, %v602_v15  ;;  %v606_v30 = vld [vmem:[%s5144_s3 + $0x810] sm:$0xff] }
 0x134   :  { %v3453_v60 = vcombine.high %v559_v8, %v563_v24  ;;  %v610_v7 = vld [vmem:[%s5144_s3 + $0x830] sm:$0xff] }
 0x136   :  { %3009 = vmatpush1.bf16.msra.mxu0 %v3394_v27  ;;  %3132 = vmatpush1.bf16.msra.mxu1 %v3396_v28  ;;  %v567_v27 = vld [vmem:[%s5144_s3 + $0x6d8] sm:$0xff] }
 0x137   :  { %3010 = vmatprep.subr.bf16.mxu0 %v3403_v29  ;;  %3133 = vmatprep.subr.bf16.mxu1 %v3405_v31  ;;  %v571_v28 = vld [vmem:[%s5144_s3 + $0x6f8] sm:$0xff]  ;;  %v3450_v29 = vcombine.low %v558_v35, %v562_v22  ;;  %v3452_v31 = vcombine.low %v559_v8, %v563_v24  ;;  %v3499_v35 = vcombine.high %v606_v30, %v610_v7  ;;  %v614_v8 = vld [vmem:[%s5144_s3 + $0x850] sm:$0xff] }
 0x138   :  { %v3461_v34 = vcombine.high %v567_v27, %v571_v28  ;;  %v618_v24 = vld [vmem:[%s5144_s3 + $0x870] sm:$0xff] }
 0x13a   :  { %3011 = vmatpush1.bf16.msra.mxu0 %v3402_v45  ;;  %3134 = vmatpush1.bf16.msra.mxu1 %v3404_v2  ;;  %v575_v45 = vld [vmem:[%s5144_s3 + $0x718] sm:$0xff] }
 0x13b   :  { %3012 = vmatprep.subr.bf16.mxu0 %v3411_v11  ;;  %3135 = vmatprep.subr.bf16.mxu1 %v3413_v12  ;;  %v579_v2 = vld [vmem:[%s5144_s3 + $0x738] sm:$0xff]  ;;  %v3458_v11 = vcombine.low %v566_v13, %v570_v1  ;;  %v3460_v12 = vcombine.low %v567_v27, %v571_v28  ;;  %v3507_v13 = vcombine.high %v614_v8, %v618_v24  ;;  %v622_v27 = vld [vmem:[%s5144_s3 + $0x890] sm:$0xff] }
 0x13c   :  { %v3469_v46 = vcombine.high %v575_v45, %v579_v2  ;;  %v626_v28 = vld [vmem:[%s5144_s3 + $0x8b0] sm:$0xff] }
 0x13e   :  { %3013 = vmatpush1.bf16.msra.mxu0 %v3410_v49  ;;  %3136 = vmatpush1.bf16.msra.mxu1 %v3412_v50  ;;  %v583_v49 = vld [vmem:[%s5144_s3 + $0x758] sm:$0xff] }
 0x13f   :  { %3014 = vmatprep.subr.bf16.mxu0 %v3419_v51  ;;  %3137 = vmatprep.subr.bf16.mxu1 %v3421_v52  ;;  %v587_v50 = vld [vmem:[%s5144_s3 + $0x778] sm:$0xff]  ;;  %v3466_v51 = vcombine.low %v574_v37, %v578_v39  ;;  %v3468_v52 = vcombine.low %v575_v45, %v579_v2  ;;  %v3515_v37 = vcombine.high %v622_v27, %v626_v28  ;;  %v630_v45 = vld [vmem:[%s5144_s3 + $0x8d0] sm:$0xff] }
 0x140   :  { %v3477_v54 = vcombine.high %v583_v49, %v587_v50  ;;  %v634_v2 = vld [vmem:[%s5144_s3 + $0x8f0] sm:$0xff] }
 0x142   :  { %3015 = vmatpush1.bf16.msra.mxu0 %v3418_v57  ;;  %3138 = vmatpush1.bf16.msra.mxu1 %v3420_v58  ;;  %v591_v57 = vld [vmem:[%s5144_s3 + $0x798] sm:$0xff] }
 0x143   :  { %3016 = vmatprep.subr.bf16.mxu0 %v3427_v63  ;;  %3139 = vmatprep.subr.bf16.mxu1 %v3429_v3  ;;  %v595_v58 = vld [vmem:[%s5144_s3 + $0x7b8] sm:$0xff]  ;;  %v3474_v63 = vcombine.low %v582_v47, %v586_v48  ;;  %v3476_v3 = vcombine.low %v583_v49, %v587_v50  ;;  %v638_v48 = vld [vmem:[%s5144_s3 + $0x910] sm:$0xff] }
 0x144   :  { %v3485_v4 = vcombine.high %v591_v57, %v595_v58  ;;  %v642_v49 = vld [vmem:[%s5144_s3 + $0x930] sm:$0xff]  ;;  %v643_v50 = vld [vmem:[%s5144_s3 + $0x938] sm:$0xff] }
 0x146   :  { %3017 = vmatpush1.bf16.msra.mxu0 %v3426_v17  ;;  %3140 = vmatpush1.bf16.msra.mxu1 %v3428_v59  ;;  %v599_v17 = vld [vmem:[%s5144_s3 + $0x7d8] sm:$0xff] }
 0x147   :  { %3018 = vmatprep.subr.bf16.mxu0 %v3435_v18  ;;  %3141 = vmatprep.subr.bf16.mxu1 %v3437_v62  ;;  %v603_v59 = vld [vmem:[%s5144_s3 + $0x7f8] sm:$0xff]  ;;  %v3482_v18 = vcombine.low %v590_v55, %v594_v56  ;;  %v3484_v62 = vcombine.low %v591_v57, %v595_v58  ;;  %v646_v55 = vld [vmem:[%s5144_s3 + $0x950] sm:$0xff] }
 0x148   :  { %v3493_v6 = vcombine.high %v599_v17, %v603_v59  ;;  %v650_v56 = vld [vmem:[%s5144_s3 + $0x970] sm:$0xff]  ;;  %v647_v57 = vld [vmem:[%s5144_s3 + $0x958] sm:$0xff] }
 0x149   :  { %v651_v58 = vld [vmem:[%s5144_s3 + $0x978] sm:$0xff] }
 0x14a   :  { %3019 = vmatpush1.bf16.msra.mxu0 %v3434_v20  ;;  %3142 = vmatpush1.bf16.msra.mxu1 %v3436_v0  ;;  %v607_v20 = vld [vmem:[%s5144_s3 + $0x818] sm:$0xff] }
 0x14b   :  { %3020 = vmatprep.subr.bf16.mxu0 %v3443_v21  ;;  %3143 = vmatprep.subr.bf16.mxu1 %v3445_v23  ;;  %v611_v0 = vld [vmem:[%s5144_s3 + $0x838] sm:$0xff]  ;;  %v3490_v21 = vcombine.low %v598_v9, %v602_v15  ;;  %v3492_v23 = vcombine.low %v599_v17, %v603_v59  ;;  %v654_v9 = vld [vmem:[%s5144_s3 + $0x990] sm:$0xff] }
 0x14c   :  { %v3501_v22 = vcombine.high %v607_v20, %v611_v0  ;;  %v658_v15 = vld [vmem:[%s5144_s3 + $0x9b0] sm:$0xff]  ;;  %v655_v17 = vld [vmem:[%s5144_s3 + $0x998] sm:$0xff] }
 0x14d   :  { %v659_v59 = vld [vmem:[%s5144_s3 + $0x9b8] sm:$0xff] }
 0x14e   :  { %3021 = vmatpush1.bf16.msra.mxu0 %v3442_v25  ;;  %3144 = vmatpush1.bf16.msra.mxu1 %v3444_v61  ;;  %v615_v25 = vld [vmem:[%s5144_s3 + $0x858] sm:$0xff] }
 0x14f   :  { %3022 = vmatprep.subr.bf16.mxu0 %v3451_v26  ;;  %3145 = vmatprep.subr.bf16.mxu1 %v3453_v60  ;;  %v619_v61 = vld [vmem:[%s5144_s3 + $0x878] sm:$0xff]  ;;  %v3498_v26 = vcombine.low %v606_v30, %v610_v7  ;;  %v3500_v60 = vcombine.low %v607_v20, %v611_v0  ;;  %v662_v30 = vld [vmem:[%s5144_s3 + $0x9d0] sm:$0xff] }
 0x150   :  { %v3509_v1 = vcombine.high %v615_v25, %v619_v61  ;;  %v666_v7 = vld [vmem:[%s5144_s3 + $0x9f0] sm:$0xff]  ;;  %v663_v20 = vld [vmem:[%s5144_s3 + $0x9d8] sm:$0xff] }
 0x151   :  { %v667_v0 = vld [vmem:[%s5144_s3 + $0x9f8] sm:$0xff] }
 0x152   :  { %3023 = vmatpush1.bf16.msra.mxu0 %v3450_v29  ;;  %3146 = vmatpush1.bf16.msra.mxu1 %v3452_v31  ;;  %v623_v29 = vld [vmem:[%s5144_s3 + $0x898] sm:$0xff] }
 0x153   :  { %3024 = vmatprep.subr.bf16.mxu0 %v3459_v33  ;;  %3147 = vmatprep.subr.bf16.mxu1 %v3461_v34  ;;  %v627_v31 = vld [vmem:[%s5144_s3 + $0x8b8] sm:$0xff]  ;;  %v3506_v33 = vcombine.low %v614_v8, %v618_v24  ;;  %v3508_v34 = vcombine.low %v615_v25, %v619_v61  ;;  %v670_v8 = vld [vmem:[%s5144_s3 + $0xa10] sm:$0xff] }
 0x154   :  { %v3517_v39 = vcombine.high %v623_v29, %v627_v31  ;;  %v674_v24 = vld [vmem:[%s5144_s3 + $0xa30] sm:$0xff]  ;;  %v671_v25 = vld [vmem:[%s5144_s3 + $0xa18] sm:$0xff] }
 0x155   :  { %v675_v61 = vld [vmem:[%s5144_s3 + $0xa38] sm:$0xff] }
 0x156   :  { %3025 = vmatpush1.bf16.msra.mxu0 %v3458_v11  ;;  %3148 = vmatpush1.bf16.msra.mxu1 %v3460_v12  ;;  %v635_v11 = vld [vmem:[%s5144_s3 + $0x8f8] sm:$0xff]  ;;  %v3514_v12 = vcombine.low %v622_v27, %v626_v28  ;;  %v678_v27 = vld [vmem:[%s5144_s3 + $0xa50] sm:$0xff] }
 0x157   :  { %3026 = vmatprep.subr.bf16.mxu0 %v3467_v14  ;;  %3149 = vmatprep.subr.bf16.mxu1 %v3469_v46  ;;  %v3516_v14 = vcombine.low %v623_v29, %v627_v31  ;;  %v3523_v46 = vcombine.high %v630_v45, %v634_v2  ;;  %v682_v28 = vld [vmem:[%s5144_s3 + $0xa70] sm:$0xff]  ;;  %v679_v29 = vld [vmem:[%s5144_s3 + $0xa58] sm:$0xff] }
 0x158   :  { %v683_v31 = vld [vmem:[%s5144_s3 + $0xa78] sm:$0xff] }
 0x15a   :  { %3027 = vmatpush1.bf16.msra.mxu0 %v3466_v51  ;;  %3150 = vmatpush1.bf16.msra.mxu1 %v3468_v52  ;;  %v3522_v51 = vcombine.low %v630_v45, %v634_v2  ;;  %v686_v45 = vld [vmem:[%s5144_s3 + $0xa90] sm:$0xff] }
 0x15b   :  { %3028 = vmatprep.subr.bf16.mxu0 %v3475_v53  ;;  %3151 = vmatprep.subr.bf16.mxu1 %v3477_v54  ;;  %v3531_v53 = vcombine.high %v638_v48, %v642_v49  ;;  %v690_v2 = vld [vmem:[%s5144_s3 + $0xab0] sm:$0xff] }
 0x15e   :  { %3029 = vmatpush1.bf16.msra.mxu0 %v3474_v63  ;;  %3152 = vmatpush1.bf16.msra.mxu1 %v3476_v3  ;;  %v3530_v63 = vcombine.low %v638_v48, %v642_v49  ;;  %v694_v48 = vld [vmem:[%s5144_s3 + $0xad0] sm:$0xff] }
 0x15f   :  { %3030 = vmatprep.subr.bf16.mxu0 %v3483_v32  ;;  %3153 = vmatprep.subr.bf16.mxu1 %v3485_v4  ;;  %v3539_v32 = vcombine.high %v646_v55, %v650_v56  ;;  %v3541_v4 = vcombine.high %v647_v57, %v651_v58  ;;  %v698_v49 = vld [vmem:[%s5144_s3 + $0xaf0] sm:$0xff] }
 0x162   :  { %3031 = vmatpush1.bf16.msra.mxu0 %v3482_v18  ;;  %3154 = vmatpush1.bf16.msra.mxu1 %v3484_v62  ;;  %v3538_v18 = vcombine.low %v646_v55, %v650_v56  ;;  %v3540_v62 = vcombine.low %v647_v57, %v651_v58  ;;  %v702_v55 = vld [vmem:[%s5144_s3 + $0xb10] sm:$0xff]  ;;  %v703_v57 = vld [vmem:[%s5144_s3 + $0xb18] sm:$0xff] }
 0x163   :  { %3032 = vmatprep.subr.bf16.mxu0 %v3491_v5  ;;  %3155 = vmatprep.subr.bf16.mxu1 %v3493_v6  ;;  %v3547_v5 = vcombine.high %v654_v9, %v658_v15  ;;  %v3549_v6 = vcombine.high %v655_v17, %v659_v59  ;;  %v706_v56 = vld [vmem:[%s5144_s3 + $0xb30] sm:$0xff]  ;;  %v707_v58 = vld [vmem:[%s5144_s3 + $0xb38] sm:$0xff] }
 0x166   :  { %3033 = vmatpush1.bf16.msra.mxu0 %v3490_v21  ;;  %3156 = vmatpush1.bf16.msra.mxu1 %v3492_v23  ;;  %v3546_v21 = vcombine.low %v654_v9, %v658_v15  ;;  %v3548_v23 = vcombine.low %v655_v17, %v659_v59  ;;  %v710_v9 = vld [vmem:[%s5144_s3 + $0xb50] sm:$0xff]  ;;  %v711_v17 = vld [vmem:[%s5144_s3 + $0xb58] sm:$0xff] }
 0x167   :  { %3043 = vmatprep.subr.bf16.mxu0 %v3499_v35  ;;  %3166 = vmatprep.subr.bf16.mxu1 %v3501_v22  ;;  %v3555_v35 = vcombine.high %v662_v30, %v666_v7  ;;  %v3557_v22 = vcombine.high %v663_v20, %v667_v0  ;;  %v714_v15 = vld [vmem:[%s5144_s3 + $0xb70] sm:$0xff]  ;;  %v715_v59 = vld [vmem:[%s5144_s3 + $0xb78] sm:$0xff] }
 0x169   :  { %3035 = vmatmul.mubr.bf16.vlgmr.msra.gmra.mrb[4].mxu0 %v4346_v16  ;;  %3158 = vmatmul.mubr.bf16.vlgmr.msra.gmra.mrb[4].mxu1 %v4346_v16  ;;  %v631_v16 = vld [vmem:[%s5144_s3 + $0x8d8] sm:$0xff] }
 0x16a   :  { %3044 = vmatpush1.bf16.msra.mxu0 %v3498_v26  ;;  %3167 = vmatpush1.bf16.msra.mxu1 %v3500_v60  ;;  %v3525_v47 = vcombine.high %v631_v16, %v635_v11  ;;  %v3524_v52 = vcombine.low %v631_v16, %v635_v11  ;;  %v3554_v26 = vcombine.low %v662_v30, %v666_v7  ;;  %v687_v16 = vld [vmem:[%s5144_s3 + $0xa98] sm:$0xff]  ;;  %v718_v30 = vld [vmem:[%s5144_s3 + $0xb90] sm:$0xff] }
 0x16b   :  { %3045 = vmatprep.subr.bf16.mxu0 %v3507_v13  ;;  %3168 = vmatprep.subr.bf16.mxu1 %v3509_v1  ;;  %v3556_v60 = vcombine.low %v663_v20, %v667_v0  ;;  %v3563_v13 = vcombine.high %v670_v8, %v674_v24  ;;  %v3565_v1 = vcombine.high %v671_v25, %v675_v61  ;;  %v691_v11 = vld [vmem:[%s5144_s3 + $0xab8] sm:$0xff]  ;;  %v722_v7 = vld [vmem:[%s5144_s3 + $0xbb0] sm:$0xff] }
 0x16c   :  { %3075 = vmatprep.mubr.bf16.mxu0 %v4362_v10  ;;  %3198 = vmatprep.mubr.bf16.mxu1 %v4362_v10  ;;  %v639_v10 = vld [vmem:[%s5144_s3 + $0x918] sm:$0xff] }
 0x16d   :  { %v3533_v54 = vcombine.high %v639_v10, %v643_v50  ;;  %v3532_v3 = vcombine.low %v639_v10, %v643_v50  ;;  %v695_v10 = vld [vmem:[%s5144_s3 + $0xad8] sm:$0xff] }
 0x16e   :  { %3046 = vmatpush1.bf16.msra.mxu0 %v3506_v33  ;;  %3169 = vmatpush1.bf16.msra.mxu1 %v3508_v34  ;;  %v3562_v33 = vcombine.low %v670_v8, %v674_v24  ;;  %v3564_v34 = vcombine.low %v671_v25, %v675_v61  ;;  %v699_v50 = vld [vmem:[%s5144_s3 + $0xaf8] sm:$0xff]  ;;  %v726_v8 = vld [vmem:[%s5144_s3 + $0xbd0] sm:$0xff] }
 0x16f   :  { %3047 = vmatprep.subr.bf16.mxu0 %v3515_v37  ;;  %3170 = vmatprep.subr.bf16.mxu1 %v3517_v39  ;;  %v3571_v37 = vcombine.high %v678_v27, %v682_v28  ;;  %v3573_v39 = vcombine.high %v679_v29, %v683_v31  ;;  %v719_v20 = vld [vmem:[%s5144_s3 + $0xb98] sm:$0xff]  ;;  %v730_v24 = vld [vmem:[%s5144_s3 + $0xbf0] sm:$0xff] }
 0x170   :  { %v723_v0 = vld [vmem:[%s5144_s3 + $0xbb8] sm:$0xff] }
 0x171   :  { %v727_v25 = vld [vmem:[%s5144_s3 + $0xbd8] sm:$0xff] }
 0x172   :  { %3048 = vmatpush1.bf16.msra.mxu0 %v3514_v12  ;;  %3171 = vmatpush1.bf16.msra.mxu1 %v3516_v14  ;;  %v3570_v12 = vcombine.low %v678_v27, %v682_v28  ;;  %v3572_v14 = vcombine.low %v679_v29, %v683_v31  ;;  %v731_v61 = vld [vmem:[%s5144_s3 + $0xbf8] sm:$0xff]  ;;  %v3618_v27 = vcombine.low %v726_v8, %v730_v24  ;;  %v732_v29 = vld [vmem:[%s5145_s4] sm:$0xff]  ;;  %s3710_s4 = smov [#allocation3]  }
 0x173   :  { %3049 = vmatprep.subr.bf16.mxu0 %v3523_v46  ;;  %3172 = vmatprep.subr.bf16.mxu1 %v3525_v47  ;;  %v3579_v46 = vcombine.high %v686_v45, %v690_v2  ;;  %v3581_v47 = vcombine.high %v687_v16, %v691_v11  ;;  %v3620_v28 = vcombine.low %v727_v25, %v731_v61  ;;  %s3221_s6 = sshll.u32 %s3710_s4, 4  ;;  %s3222_s6 = int_to_ptr.vmem [resolvable:$true] %s3221_s6 }
 0x174   :  { %v737_v31 = vrot.slane %v732_v29, %v4074_v38  ;;  %s3685_s7 = scalar_lea.vmem %s3222_s6, 1024  ;;  %p3690_p1 = scmp.lt.s32.totalorder %s3222_s6, %s3222_s6 }
 0x175   :  { %p3686_p0 = scmp.ne.s32.totalorder %s3222_s6, %s3685_s7  ;;  %p3691_p2 = scmp.lt.s32.totalorder %s3685_s7, %s3685_s7 }
 0x176   :  { %3050 = vmatpush1.bf16.msra.mxu0 %v3522_v51  ;;  %3173 = vmatpush1.bf16.msra.mxu1 %v3524_v52  ;;  %v3578_v51 = vcombine.low %v686_v45, %v690_v2  ;;  %v3580_v52 = vcombine.low %v687_v16, %v691_v11 }
 0x177   :  { %3051 = vmatprep.subr.bf16.mxu0 %v3531_v53  ;;  %3174 = vmatprep.subr.bf16.mxu1 %v3533_v54  ;;  %v3587_v53 = vcombine.high %v694_v48, %v698_v49  ;;  %v3589_v54 = vcombine.high %v695_v10, %v699_v50  ;;  %p3692_p3 = por %p3691_p2, %p3690_p1 }
 0x179   :  { %p3693_p4 = pnand %p3692_p3, %p3686_p0 }
 0x17a   :  { %3052 = vmatpush1.bf16.msra.mxu0 %v3530_v63  ;;  %3175 = vmatpush1.bf16.msra.mxu1 %v3532_v3  ;;  %v3586_v63 = vcombine.low %v694_v48, %v698_v49  ;;  %v3588_v3 = vcombine.low %v695_v10, %v699_v50  ;;  %v757_v10 = vrot.slane %v732_v29, %v4089_v44 }
 0x17b   :  { %3053 = vmatprep.subr.bf16.mxu0 %v3539_v32  ;;  %3176 = vmatprep.subr.bf16.mxu1 %v3541_v4  ;;  %v3595_v32 = vcombine.high %v702_v55, %v706_v56  ;;  %v3597_v4 = vcombine.high %v703_v57, %v707_v58 }
 0x17e   :  { %3054 = vmatpush1.bf16.msra.mxu0 %v3538_v18  ;;  %3177 = vmatpush1.bf16.msra.mxu1 %v3540_v62  ;;  %v3594_v18 = vcombine.low %v702_v55, %v706_v56  ;;  %v3596_v62 = vcombine.low %v703_v57, %v707_v58 }
 0x17f   :  { %3055 = vmatprep.subr.bf16.mxu0 %v3547_v5  ;;  %3178 = vmatprep.subr.bf16.mxu1 %v3549_v6  ;;  %v3603_v5 = vcombine.high %v710_v9, %v714_v15  ;;  %v3605_v6 = vcombine.high %v711_v17, %v715_v59 }
 0x182   :  { %3056 = vmatpush1.bf16.msra.mxu0 %v3546_v21  ;;  %3179 = vmatpush1.bf16.msra.mxu1 %v3548_v23  ;;  %v3602_v21 = vcombine.low %v710_v9, %v714_v15  ;;  %v3604_v23 = vcombine.low %v711_v17, %v715_v59 }
 0x183   :  { %3057 = vmatprep.subr.bf16.mxu0 %v3555_v35  ;;  %3180 = vmatprep.subr.bf16.mxu1 %v3557_v22  ;;  %v3611_v35 = vcombine.high %v718_v30, %v722_v7  ;;  %v3613_v22 = vcombine.high %v719_v20, %v723_v0 }
 0x186   :  { %3058 = vmatpush1.bf16.msra.mxu0 %v3554_v26  ;;  %3181 = vmatpush1.bf16.msra.mxu1 %v3556_v60  ;;  %v3610_v26 = vcombine.low %v718_v30, %v722_v7  ;;  %v3612_v60 = vcombine.low %v719_v20, %v723_v0 }
 0x187   :  { %3059 = vmatprep.subr.bf16.mxu0 %v3563_v13  ;;  %3182 = vmatprep.subr.bf16.mxu1 %v3565_v1  ;;  %v3619_v13 = vcombine.high %v726_v8, %v730_v24  ;;  %v3621_v1 = vcombine.high %v727_v25, %v731_v61 }
 0x18a   :  { %3060 = vmatpush1.bf16.msra.mxu0 %v3562_v33  ;;  %3183 = vmatpush1.bf16.msra.mxu1 %v3564_v34  ;;  %v745_v33 = vrot.slane %v732_v29, %v4080_v41  ;;  %v741_v34 = vrot.slane %v732_v29, %v4077_v40  ;;  %v760_v40 = vsub.s32 6, %v4065_v19  ;;  %v764_v41 = vsub.s32 7, %v4065_v19 }
 0x18b   :  { %3061 = vmatprep.subr.bf16.mxu0 %v3571_v37  ;;  %3184 = vmatprep.subr.bf16.mxu1 %v3573_v39  ;;  %v749_v37 = vrot.slane %v732_v29, %v4083_v42  ;;  %v753_v42 = vrot.slane %v732_v29, %v4086_v43 }
 0x18c   :  { %v761_v49 = vrot.slane %v732_v29, %v760_v40  ;;  %v765_v50 = vrot.slane %v732_v29, %v764_v41 }
 0x18e   :  { %3062 = vmatpush1.bf16.msra.mxu0 %v3570_v12  ;;  %3185 = vmatpush1.bf16.msra.mxu1 %v3572_v14 }
 0x18f   :  { %3063 = vmatprep.subr.bf16.mxu0 %v3579_v46  ;;  %3186 = vmatprep.subr.bf16.mxu1 %v3581_v47 }
 0x192   :  { %3064 = vmatpush1.bf16.msra.mxu0 %v3578_v51  ;;  %3187 = vmatpush1.bf16.msra.mxu1 %v3580_v52 }
 0x193   :  { %3065 = vmatprep.subr.bf16.mxu0 %v3587_v53  ;;  %3188 = vmatprep.subr.bf16.mxu1 %v3589_v54 }
 0x196   :  { %3066 = vmatpush1.bf16.msra.mxu0 %v3586_v63  ;;  %3189 = vmatpush1.bf16.msra.mxu1 %v3588_v3 }
 0x197   :  { %3067 = vmatprep.subr.bf16.mxu0 %v3595_v32  ;;  %3190 = vmatprep.subr.bf16.mxu1 %v3597_v4 }
 0x19a   :  { %3068 = vmatpush1.bf16.msra.mxu0 %v3594_v18  ;;  %3191 = vmatpush1.bf16.msra.mxu1 %v3596_v62 }
 0x19b   :  { %3069 = vmatprep.subr.bf16.mxu0 %v3603_v5  ;;  %3192 = vmatprep.subr.bf16.mxu1 %v3605_v6 }
 0x19e   :  { %3070 = vmatpush1.bf16.msra.mxu0 %v3602_v21  ;;  %3193 = vmatpush1.bf16.msra.mxu1 %v3604_v23 }
 0x19f   :  { %3071 = vmatprep.subr.bf16.mxu0 %v3611_v35  ;;  %3194 = vmatprep.subr.bf16.mxu1 %v3613_v22 }
 0x1a2   :  { %3072 = vmatpush1.bf16.msra.mxu0 %v3610_v26  ;;  %3195 = vmatpush1.bf16.msra.mxu1 %v3612_v60 }
 0x1a3   :  { %3073 = vmatprep.subr.bf16.mxu0 %v3619_v13  ;;  %3196 = vmatprep.subr.bf16.mxu1 %v3621_v1 }
 0x1a6   :  { %3074 = vmatpush1.bf16.msra.mxu0 %v3618_v27  ;;  %3197 = vmatpush1.bf16.msra.mxu1 %v3620_v28 }
 0x1a9   :  { %3076 = vmatmul.mubr.bf16.vlgmr.msra.gmra.mrb[4].mxu0 %v4550_v36  ;;  %3199 = vmatmul.mubr.bf16.vlgmr.msra.gmra.mrb[4].mxu1 %v4550_v36 }
 0x1bc   :  { %v2831_v39 = vpop.f32.mrb[0].mxu0  ;;  %v2954_v45 = vpop.f32.mrb[0].mxu1 }
 0x1bd   :  { %v3631_v2 = vadd.f32 %v2831_v39, %v737_v31  ;;  %v3633_v16 = vadd.f32 %v2954_v45, %v745_v33  ;;  %v2833_v11 = vpop.f32.mrb[1].mxu0  ;;  %v2956_v12 = vpop.f32.mrb[1].mxu1 }
 0x1be   :  { %v3632_v14 = vadd.f32 %v2833_v11, %v741_v34  ;;  %v3634_v36 = vadd.f32 %v2956_v12, %v749_v37  ;;  %v2835_v46 = vpop.f32.mrb[2].mxu0  ;;  %v2958_v47 = vpop.f32.mrb[2].mxu1 }
 0x1bf   :  { %3207 = vst [vmem:[#allocation3] sm:$0xff] %v3631_v2  ;;  %3209 = vst [vmem:[#allocation3 + $0x10] sm:$0xff] %v3633_v16  ;;  %v2836_v48 = vpop.f32.mrb[3].mxu0  ;;  %v2959_v38 = vpop.f32.mrb[3].mxu1 }
 0x1c0   :  { %3208 = vst [vmem:[#allocation3 + $0x8] sm:$0xff] %v3632_v14  ;;  %3210 = vst [vmem:[#allocation3 + $0x18] sm:$0xff] %v3634_v36 }
 0x27c   :  { %v3077_v51 = vpop.f32.mrb[4].mxu0  ;;  %v3200_v52 = vpop.f32.mrb[4].mxu1 }
 0x27d   :  { %v3635_v53 = vadd.f32 %v3077_v51, %v753_v42  ;;  %v3637_v54 = vadd.f32 %v3200_v52, %v761_v49  ;;  %v3079_v55 = vpop.f32.mrb[5].mxu0  ;;  %v3202_v56 = vpop.f32.mrb[5].mxu1 }
 0x27e   :  { %v3636_v57 = vadd.f32 %v3079_v55, %v757_v10  ;;  %v3638_v58 = vadd.f32 %v3202_v56, %v765_v50  ;;  %v3081_v63 = vpop.f32.mrb[6].mxu0  ;;  %v3204_v3 = vpop.f32.mrb[6].mxu1 }
 0x27f   :  { %3211 = vst [vmem:[#allocation3 + $0x20] sm:$0xff] %v3635_v53  ;;  %3213 = vst [vmem:[#allocation3 + $0x30] sm:$0xff] %v3637_v54  ;;  %v3082_v19 = vpop.f32.mrb[7].mxu0  ;;  %v3205_v43 = vpop.f32.mrb[7].mxu1 }
 0x280   :  { %3212 = vst [vmem:[#allocation3 + $0x28] sm:$0xff] %v3636_v57  ;;  %3214 = vst [vmem:[#allocation3 + $0x38] sm:$0xff] %v3638_v58 }
 0x281   :  { %3696 = shalt.err (!%p3693_p4)
}
 0x282   :  { %s3697_s10 = scalar_lea.hbm %s5146_s5, 1024 }
 0x283   :  { %p3698_p5 = scmp.ne.s32.totalorder %s5146_s5, %s3697_s10  ;;  %p3701_p6 = scmp.lt.u32.totalorder %s3697_s10, %s5146_s5 }
 0x285   :  { %p3703_p7 = pnand %p3701_p6, %p3698_p5 }
 0x287   :  { %3706 = shalt.err (!%p3703_p7)
}
 0x288   :  { %3224 = dma.vmem_to_hbm [thread:$0]  %s3222_s6, 1024, %s5146_s5, [#allocation4]  }
 0x289   :  { %3707 = dma.done.wait [#allocation4], 1024  }
 0x28a   :  { %3708 = vsyncadd [#allocation4], 4294966272 }
 0x28b   :  { %3228 = vsyncpa [#allocation4], 1 }

</bundles_post_ra>
